<compile_context>
chip_gen: v7x
topology: tpu7x:2x2x1
jax: 0.10.0
libtpu: 0.0.40
codegen_flags: <defaults>
</compile_context>

<pallas_src>
import jax
import jax.numpy as jnp
from jax import lax
from jax.experimental import pallas as pl
from jax.experimental.pallas import tpu as pltpu


# ----------------------------------------------------------------------------
# Helpers
# ----------------------------------------------------------------------------
def _round_up(x: int, m: int) -> int:
    return ((x + m - 1) // m) * m


def _vmem_capacity_bytes() -> int:
    """Generation-aware VMEM capacity (falls back to the smallest, v7x's 64 MiB)."""
    try:
        info = pltpu.get_tpu_info()
        cap = getattr(info, "vmem_capacity_bytes", None)
        if cap:
            return int(cap)
    except Exception:
        pass
    return 64 * 1024 * 1024


# ----------------------------------------------------------------------------
# SkipGram forward (n_neg_samples > 0 branch) — single pallas_call
# ----------------------------------------------------------------------------
def skipgram_forward(params, input_dict):
    center_w = params["center_embeddings"]     # [V, D]
    context_w = params["context_embeddings"]   # [V, D]
    V, D = center_w.shape
    out_dtype = center_w.dtype

    def _as_2d(a):
        a = jnp.asarray(a)
        return a[:, None] if a.ndim == 1 else a

    # Clamp indices: VMEM refs have no runtime bounds check (silent garbage).
    pc = jnp.clip(_as_2d(input_dict["pos_center"]).astype(jnp.int32), 0, V - 1)
    px = jnp.clip(_as_2d(input_dict["pos_context"]).astype(jnp.int32), 0, V - 1)
    nc = jnp.clip(_as_2d(input_dict["neg_context"]).astype(jnp.int32), 0, V - 1)

    B, NC = pc.shape
    _, NX = px.shape
    _, K = nc.shape

    # ---- batch tile: multiple of 8, <= 128; keep >= 2 grid steps when B >= 16
    if B > 256:
        TB = 128
    elif B >= 16:
        TB = _round_up(pl.cdiv(B, 2), 8)
    else:
        TB = _round_up(B, 8)
    B_pad = _round_up(B, TB)
    grid = (B_pad // TB,)

    def _pad_batch(a):
        if a.shape[0] == B_pad:
            return a
        return jnp.pad(a, ((0, B_pad - a.shape[0]), (0, 0)))  # pad with idx 0 (valid)

    # 1-D int32 index arrays for scalar prefetch (2-D SMEM pads last dim to 128).
    pc_flat = _pad_batch(pc).reshape(-1)    # (B_pad * NC,)
    px_flat = _pad_batch(px).reshape(-1)    # (B_pad * NX,)
    nc_flat = _pad_batch(nc).reshape(-1)    # (B_pad * K,)

    # ---- generation-aware VMEM budget (double buffers per pipelined operand)
    itemsize = center_w.dtype.itemsize
    table_bytes = V * D * itemsize
    out_block_bytes = (2 * TB * D + TB * K * D) * jnp.dtype(out_dtype).itemsize
    scratch_bytes = 3 * TB * D * 4
    vmem_cap = _vmem_capacity_bytes()
    need = 4 * table_bytes + 2 * out_block_bytes + scratch_bytes + (4 << 20)
    if need > vmem_cap:
        # TODO(synk): manual double-buffered DMA-gather fallback for huge vocabs.
        raise NotImplementedError(
            f"embedding tables ({2 * table_bytes >> 20} MiB) too large for the "
            f"VMEM-resident gather path on this chip ({vmem_cap >> 20} MiB VMEM)")
    vmem_limit = int(min(vmem_cap, max(need, 32 << 20)))

    UNROLL = 8  # TB is a multiple of 8 by construction

    # ------------------------------------------------------------------
    # Kernel body: one batch block of TB rows per grid step.
    # Args: prefetch (SMEM) | inputs (VMEM) | outputs | scratch.
    # ------------------------------------------------------------------
    def kernel(pc_ref, px_ref, nc_ref,                 # 1-D SMEM index arrays
               center_ref, context_ref,                # full tables, VMEM-resident
               pc_out, px_out, nc_out,                 # (TB,D), (TB,D), (TB*K,D)
               gat_ref, sum_ref, cnt_ref):             # (TB,D) VMEM scratches
        base = pl.program_id(0) * TB

        def combine(out_ref, table_ref, idx_ref, n_grams):
            # Fused combine_ngram_embeddings(reduce='mean'):
            #   (mean / (clip(nonzero,1)/N)) == sum / clip(nonzero, 1)
            for n in range(n_grams):                   # n_grams is small: unrolled
                def gather_body(i, carry):
                    for u in range(UNROLL):
                        b = i * UNROLL + u
                        row = idx_ref[(base + b) * n_grams + n]
                        gat_ref[pl.ds(b, 1), :] = table_ref[pl.ds(row, 1), :]
                    return carry
                lax.fori_loop(0, TB // UNROLL, gather_body, 0)

                g = gat_ref[...].astype(jnp.float32)          # (TB, D) full tile
                nz = (g != 0.0).astype(jnp.float32)
                if n == 0:
                    sum_ref[...] = g
                    cnt_ref[...] = nz
                else:
                    sum_ref[...] = sum_ref[...] + g
                    cnt_ref[...] = cnt_ref[...] + nz
            out_ref[...] = (sum_ref[...] /
                            jnp.maximum(cnt_ref[...], 1.0)).astype(out_ref.dtype)

        # pos_center / pos_context: gather + ngram combine
        combine(pc_out, center_ref, pc_ref, NC)
        combine(px_out, context_ref, px_ref, NX)

        # neg_context: plain gather, rows stored straight into the output block
        def neg_body(b, carry):
            for k in range(K):                          # K is small: unrolled
                row = nc_ref[(base + b) * K + k]
                nc_out[pl.ds(b * K + k, 1), :] = context_ref[pl.ds(row, 1), :]
            return carry
        lax.fori_loop(0, TB, neg_body, 0)

    # ------------------------------------------------------------------
    # pallas_call
    # ------------------------------------------------------------------
    pc_out, px_out, nc_out = pl.pallas_call(
        kernel,
        out_shape=(
            jax.ShapeDtypeStruct((B_pad, D), out_dtype),        # pos_center
            jax.ShapeDtypeStruct((B_pad, D), out_dtype),        # pos_context
            jax.ShapeDtypeStruct((B_pad * K, D), out_dtype),    # neg_context (flat)
        ),
        grid_spec=pltpu.PrefetchScalarGridSpec(
            num_scalar_prefetch=3,                      # pc_flat, px_flat, nc_flat
            grid=grid,
            in_specs=(
                # Full tables, constant block index -> DMA'd once, VMEM-resident.
                pl.BlockSpec((V, D), lambda i, pc, px, nc: (0, 0)),
                pl.BlockSpec((V, D), lambda i, pc, px, nc: (0, 0)),
            ),
            out_specs=(
                pl.BlockSpec((TB, D), lambda i, pc, px, nc: (i, 0)),
                pl.BlockSpec((TB, D), lambda i, pc, px, nc: (i, 0)),
                pl.BlockSpec((TB * K, D), lambda i, pc, px, nc: (i, 0)),
            ),
            scratch_shapes=[
                pltpu.VMEM((TB, D), center_w.dtype),    # gather staging
                pltpu.VMEM((TB, D), jnp.float32),       # running sum
                pltpu.VMEM((TB, D), jnp.float32),       # running nonzero count
            ],
        ),
        compiler_params=pltpu.CompilerParams(
            dimension_semantics=("parallel",),          # shard batch blocks over TCs
            vmem_limit_bytes=vmem_limit,
        ),
    )(pc_flat, px_flat, nc_flat, center_w, context_w)

    return {
        "pos_center": pc_out[:B],
        "pos_context": px_out[:B],
        "neg_context": nc_out.reshape(B_pad, K, D)[:B],
    }


# ----------------------------------------------------------------------------
# Pure-JAX reference (mirrors the PyTorch module exactly)
# ----------------------------------------------------------------------------
def _combine_ref(x):
    n = x.shape[-2]
    cnt = (x != 0).sum(axis=-2)
    norm = jnp.clip(cnt, 1, None) / n
    return x.mean(axis=-2) / norm


def skipgram_forward_ref(params, input_dict):
    cw, xw = params["center_embeddings"], params["context_embeddings"]
    pc = cw[input_dict["pos_center"]]
    px = xw[input_dict["pos_context"]]
    nx = xw[input_dict["neg_context"]]
    return {
        "pos_center": _combine_ref(pc),
        "pos_context": _combine_ref(px),
        "neg_context": nx,
    }


if __name__ == "__main__":
    # Small deterministic config (shapes follow SkipGram.__init__ / forward).
    V = 256          # vocab_sizes['total']
    D = 128          # d_embed
    B = 8            # batch
    N = 4            # ngram slots per token
    K = 8            # n_neg_samples
    PAD_ID = 0       # special_tokens['[PAD]']

    key = jax.random.PRNGKey(0)
    k_c, k_x, k_pc, k_px, k_nc = jax.random.split(key, 5)

    bounds = 1.0 / D
    # center: uniform(-1/D, 1/D) as in the module; context: small random values
    # instead of the module's all-zeros so the test is non-trivial.
    center_w = jax.random.uniform(k_c, (V, D), jnp.float32, -bounds, bounds)
    context_w = jax.random.uniform(k_x, (V, D), jnp.float32, -bounds, bounds)
    # padding_idx row is zeroed (as nn.Embedding(padding_idx=...) does); this
    # exercises the nonzero-count normalisation in combine_ngram_embeddings.
    center_w = center_w.at[PAD_ID].set(0.0)
    context_w = context_w.at[PAD_ID].set(0.0)
    params = {"center_embeddings": center_w, "context_embeddings": context_w}

    input_dict = {
        "pos_center": jax.random.randint(k_pc, (B, N), 0, V, jnp.int32),
        "pos_context": jax.random.randint(k_px, (B, N), 0, V, jnp.int32),
        "neg_context": jax.random.randint(k_nc, (B, K), 0, V, jnp.int32),
    }

    out = skipgram_forward(params, input_dict)
    jax.block_until_ready(out)

    ref = skipgram_forward_ref(params, input_dict)
    for name in ("pos_center", "pos_context", "neg_context"):
        assert out[name].shape == ref[name].shape, name
        assert jnp.allclose(out[name], ref[name], atol=1e-6, rtol=1e-5), name

    print("KERNEL_OK")
</pallas_src>

<mosaic_0001>
module attributes {stable_mosaic.version = 11 : i64} {
  func.func @kernel(%arg0: i32, %arg1: memref<32xi32, #tpu.memory_space<smem>>, %arg2: memref<32xi32, #tpu.memory_space<smem>>, %arg3: memref<64xi32, #tpu.memory_space<smem>>, %arg4: memref<256x128xf32, #tpu.memory_space<vmem>>, %arg5: memref<256x128xf32, #tpu.memory_space<vmem>>, %arg6: memref<8x128xf32, #tpu.memory_space<vmem>>, %arg7: memref<8x128xf32, #tpu.memory_space<vmem>>, %arg8: memref<64x128xf32, #tpu.memory_space<vmem>>, %arg9: memref<8x128xf32, #tpu.memory_space<vmem>>, %arg10: memref<8x128xf32, #tpu.memory_space<vmem>>, %arg11: memref<8x128xf32, #tpu.memory_space<vmem>>) attributes {dimension_semantics = [#tpu.dimension_semantics<parallel>], iteration_bounds = array<i64: 1>, scalar_prefetch = 3 : i64, scratch_operands = 3 : i64, tpu.core_type = #tpu.core_type<tc>, window_params = [{pipeline_mode = #tpu.pipeline_mode<synchronous>, transform_indices = @transform_0, window_bounds = array<i64: 256, 128>}, {pipeline_mode = #tpu.pipeline_mode<synchronous>, transform_indices = @transform_1, window_bounds = array<i64: 256, 128>}, {transform_indices = @transform_2, window_bounds = array<i64: 8, 128>}, {transform_indices = @transform_3, window_bounds = array<i64: 8, 128>}, {transform_indices = @transform_4, window_bounds = array<i64: 64, 128>}]} {
    %c8_i32 = arith.constant 8 : i32
    %0 = arith.muli %arg0, %c8_i32 : i32
    %c0_i32 = arith.constant 0 : i32
    %c8_i32_0 = arith.constant 8 : i32
    %1 = arith.muli %c0_i32, %c8_i32_0 : i32
    %c0_i32_1 = arith.constant 0 : i32
    %2 = arith.addi %1, %c0_i32_1 : i32
    %3 = arith.addi %0, %2 : i32
    %c4_i32 = arith.constant 4 : i32
    %4 = arith.muli %3, %c4_i32 : i32
    %c0_i32_2 = arith.constant 0 : i32
    %5 = arith.addi %4, %c0_i32_2 : i32
    %6 = arith.index_cast %5 : i32 to index
    %7 = memref.load %arg1[%6] : memref<32xi32, #tpu.memory_space<smem>>
    %8 = arith.index_cast %7 : i32 to index
    %c0 = arith.constant 0 : index
    %9 = vector.load %arg4[%8, %c0] : memref<256x128xf32, #tpu.memory_space<vmem>>, vector<1x128xf32>
    %10 = arith.index_cast %2 : i32 to index
    %c0_3 = arith.constant 0 : index
    %11 = vector.load %arg9[%10, %c0_3] : memref<8x128xf32, #tpu.memory_space<vmem>>, vector<1x128xf32>
    tpu.vector_store %arg9[%10, %c0_3], %9 {strides = array<i32>} : memref<8x128xf32, #tpu.memory_space<vmem>>, vector<1x128xf32>,
    %c8_i32_4 = arith.constant 8 : i32
    %12 = arith.muli %c0_i32, %c8_i32_4 : i32
    %c1_i32 = arith.constant 1 : i32
    %13 = arith.addi %12, %c1_i32 : i32
    %14 = arith.addi %0, %13 : i32
    %c4_i32_5 = arith.constant 4 : i32
    %15 = arith.muli %14, %c4_i32_5 : i32
    %c0_i32_6 = arith.constant 0 : i32
    %16 = arith.addi %15, %c0_i32_6 : i32
    %17 = arith.index_cast %16 : i32 to index
    %18 = memref.load %arg1[%17] : memref<32xi32, #tpu.memory_space<smem>>
    %19 = arith.index_cast %18 : i32 to index
    %c0_7 = arith.constant 0 : index
    %20 = vector.load %arg4[%19, %c0_7] : memref<256x128xf32, #tpu.memory_space<vmem>>, vector<1x128xf32>
    %21 = arith.index_cast %13 : i32 to index
    %c0_8 = arith.constant 0 : index
    %22 = vector.load %arg9[%21, %c0_8] : memref<8x128xf32, #tpu.memory_space<vmem>>, vector<1x128xf32>
    tpu.vector_store %arg9[%21, %c0_8], %20 {strides = array<i32>} : memref<8x128xf32, #tpu.memory_space<vmem>>, vector<1x128xf32>,
    %c8_i32_9 = arith.constant 8 : i32
    %23 = arith.muli %c0_i32, %c8_i32_9 : i32
    %c2_i32 = arith.constant 2 : i32
    %24 = arith.addi %23, %c2_i32 : i32
    %25 = arith.addi %0, %24 : i32
    %c4_i32_10 = arith.constant 4 : i32
    %26 = arith.muli %25, %c4_i32_10 : i32
    %c0_i32_11 = arith.constant 0 : i32
    %27 = arith.addi %26, %c0_i32_11 : i32
    %28 = arith.index_cast %27 : i32 to index
    %29 = memref.load %arg1[%28] : memref<32xi32, #tpu.memory_space<smem>>
    %30 = arith.index_cast %29 : i32 to index
    %c0_12 = arith.constant 0 : index
    %31 = vector.load %arg4[%30, %c0_12] : memref<256x128xf32, #tpu.memory_space<vmem>>, vector<1x128xf32>
    %32 = arith.index_cast %24 : i32 to index
    %c0_13 = arith.constant 0 : index
    %33 = vector.load %arg9[%32, %c0_13] : memref<8x128xf32, #tpu.memory_space<vmem>>, vector<1x128xf32>
    tpu.vector_store %arg9[%32, %c0_13], %31 {strides = array<i32>} : memref<8x128xf32, #tpu.memory_space<vmem>>, vector<1x128xf32>,
    %c8_i32_14 = arith.constant 8 : i32
    %34 = arith.muli %c0_i32, %c8_i32_14 : i32
    %c3_i32 = arith.constant 3 : i32
    %35 = arith.addi %34, %c3_i32 : i32
    %36 = arith.addi %0, %35 : i32
    %c4_i32_15 = arith.constant 4 : i32
    %37 = arith.muli %36, %c4_i32_15 : i32
    %c0_i32_16 = arith.constant 0 : i32
    %38 = arith.addi %37, %c0_i32_16 : i32
    %39 = arith.index_cast %38 : i32 to index
    %40 = memref.load %arg1[%39] : memref<32xi32, #tpu.memory_space<smem>>
    %41 = arith.index_cast %40 : i32 to index
    %c0_17 = arith.constant 0 : index
    %42 = vector.load %arg4[%41, %c0_17] : memref<256x128xf32, #tpu.memory_space<vmem>>, vector<1x128xf32>
    %43 = arith.index_cast %35 : i32 to index
    %c0_18 = arith.constant 0 : index
    %44 = vector.load %arg9[%43, %c0_18] : memref<8x128xf32, #tpu.memory_space<vmem>>, vector<1x128xf32>
    tpu.vector_store %arg9[%43, %c0_18], %42 {strides = array<i32>} : memref<8x128xf32, #tpu.memory_space<vmem>>, vector<1x128xf32>,
    %c8_i32_19 = arith.constant 8 : i32
    %45 = arith.muli %c0_i32, %c8_i32_19 : i32
    %c4_i32_20 = arith.constant 4 : i32
    %46 = arith.addi %45, %c4_i32_20 : i32
    %47 = arith.addi %0, %46 : i32
    %c4_i32_21 = arith.constant 4 : i32
    %48 = arith.muli %47, %c4_i32_21 : i32
    %c0_i32_22 = arith.constant 0 : i32
    %49 = arith.addi %48, %c0_i32_22 : i32
    %50 = arith.index_cast %49 : i32 to index
    %51 = memref.load %arg1[%50] : memref<32xi32, #tpu.memory_space<smem>>
    %52 = arith.index_cast %51 : i32 to index
    %c0_23 = arith.constant 0 : index
    %53 = vector.load %arg4[%52, %c0_23] : memref<256x128xf32, #tpu.memory_space<vmem>>, vector<1x128xf32>
    %54 = arith.index_cast %46 : i32 to index
    %c0_24 = arith.constant 0 : index
    %55 = vector.load %arg9[%54, %c0_24] : memref<8x128xf32, #tpu.memory_space<vmem>>, vector<1x128xf32>
    tpu.vector_store %arg9[%54, %c0_24], %53 {strides = array<i32>} : memref<8x128xf32, #tpu.memory_space<vmem>>, vector<1x128xf32>,
    %c8_i32_25 = arith.constant 8 : i32
    %56 = arith.muli %c0_i32, %c8_i32_25 : i32
    %c5_i32 = arith.constant 5 : i32
    %57 = arith.addi %56, %c5_i32 : i32
    %58 = arith.addi %0, %57 : i32
    %c4_i32_26 = arith.constant 4 : i32
    %59 = arith.muli %58, %c4_i32_26 : i32
    %c0_i32_27 = arith.constant 0 : i32
    %60 = arith.addi %59, %c0_i32_27 : i32
    %61 = arith.index_cast %60 : i32 to index
    %62 = memref.load %arg1[%61] : memref<32xi32, #tpu.memory_space<smem>>
    %63 = arith.index_cast %62 : i32 to index
    %c0_28 = arith.constant 0 : index
    %64 = vector.load %arg4[%63, %c0_28] : memref<256x128xf32, #tpu.memory_space<vmem>>, vector<1x128xf32>
    %65 = arith.index_cast %57 : i32 to index
    %c0_29 = arith.constant 0 : index
    %66 = vector.load %arg9[%65, %c0_29] : memref<8x128xf32, #tpu.memory_space<vmem>>, vector<1x128xf32>
    tpu.vector_store %arg9[%65, %c0_29], %64 {strides = array<i32>} : memref<8x128xf32, #tpu.memory_space<vmem>>, vector<1x128xf32>,
    %c8_i32_30 = arith.constant 8 : i32
    %67 = arith.muli %c0_i32, %c8_i32_30 : i32
    %c6_i32 = arith.constant 6 : i32
    %68 = arith.addi %67, %c6_i32 : i32
    %69 = arith.addi %0, %68 : i32
    %c4_i32_31 = arith.constant 4 : i32
    %70 = arith.muli %69, %c4_i32_31 : i32
    %c0_i32_32 = arith.constant 0 : i32
    %71 = arith.addi %70, %c0_i32_32 : i32
    %72 = arith.index_cast %71 : i32 to index
    %73 = memref.load %arg1[%72] : memref<32xi32, #tpu.memory_space<smem>>
    %74 = arith.index_cast %73 : i32 to index
    %c0_33 = arith.constant 0 : index
    %75 = vector.load %arg4[%74, %c0_33] : memref<256x128xf32, #tpu.memory_space<vmem>>, vector<1x128xf32>
    %76 = arith.index_cast %68 : i32 to index
    %c0_34 = arith.constant 0 : index
    %77 = vector.load %arg9[%76, %c0_34] : memref<8x128xf32, #tpu.memory_space<vmem>>, vector<1x128xf32>
    tpu.vector_store %arg9[%76, %c0_34], %75 {strides = array<i32>} : memref<8x128xf32, #tpu.memory_space<vmem>>, vector<1x128xf32>,
    %c8_i32_35 = arith.constant 8 : i32
    %78 = arith.muli %c0_i32, %c8_i32_35 : i32
    %c7_i32 = arith.constant 7 : i32
    %79 = arith.addi %78, %c7_i32 : i32
    %80 = arith.addi %0, %79 : i32
    %c4_i32_36 = arith.constant 4 : i32
    %81 = arith.muli %80, %c4_i32_36 : i32
    %c0_i32_37 = arith.constant 0 : i32
    %82 = arith.addi %81, %c0_i32_37 : i32
    %83 = arith.index_cast %82 : i32 to index
    %84 = memref.load %arg1[%83] : memref<32xi32, #tpu.memory_space<smem>>
    %85 = arith.index_cast %84 : i32 to index
    %c0_38 = arith.constant 0 : index
    %86 = vector.load %arg4[%85, %c0_38] : memref<256x128xf32, #tpu.memory_space<vmem>>, vector<1x128xf32>
    %87 = arith.index_cast %79 : i32 to index
    %c0_39 = arith.constant 0 : index
    %88 = vector.load %arg9[%87, %c0_39] : memref<8x128xf32, #tpu.memory_space<vmem>>, vector<1x128xf32>
    tpu.vector_store %arg9[%87, %c0_39], %86 {strides = array<i32>} : memref<8x128xf32, #tpu.memory_space<vmem>>, vector<1x128xf32>,
    %c1_i32_40 = arith.constant 1 : i32
    %c0_41 = arith.constant 0 : index
    %c0_42 = arith.constant 0 : index
    %89 = vector.load %arg9[%c0_41, %c0_42] : memref<8x128xf32, #tpu.memory_space<vmem>>, vector<8x128xf32>
    %cst = arith.constant 0.000000e+00 : f32
    %90 = vector.broadcast %cst : f32 to vector<8x128xf32>
    %91 = arith.cmpf one, %89, %90 : vector<8x128xf32>
    %92 = arith.extui %91 : vector<8x128xi1> to vector<8x128xi32>
    %93 = arith.sitofp %92 : vector<8x128xi32> to vector<8x128xf32>
    %c0_43 = arith.constant 0 : index
    %c0_44 = arith.constant 0 : index
    %94 = vector.load %arg10[%c0_43, %c0_44] : memref<8x128xf32, #tpu.memory_space<vmem>>, vector<8x128xf32>
    tpu.vector_store %arg10[%c0_43, %c0_44], %89 {strides = array<i32>} : memref<8x128xf32, #tpu.memory_space<vmem>>, vector<8x128xf32>,
    %c0_45 = arith.constant 0 : index
    %c0_46 = arith.constant 0 : index
    %95 = vector.load %arg11[%c0_45, %c0_46] : memref<8x128xf32, #tpu.memory_space<vmem>>, vector<8x128xf32>
    tpu.vector_store %arg11[%c0_45, %c0_46], %93 {strides = array<i32>} : memref<8x128xf32, #tpu.memory_space<vmem>>, vector<8x128xf32>,
    %c0_i32_47 = arith.constant 0 : i32
    %c8_i32_48 = arith.constant 8 : i32
    %96 = arith.muli %c0_i32_47, %c8_i32_48 : i32
    %c0_i32_49 = arith.constant 0 : i32
    %97 = arith.addi %96, %c0_i32_49 : i32
    %98 = arith.addi %0, %97 : i32
    %c4_i32_50 = arith.constant 4 : i32
    %99 = arith.muli %98, %c4_i32_50 : i32
    %c1_i32_51 = arith.constant 1 : i32
    %100 = arith.addi %99, %c1_i32_51 : i32
    %101 = arith.index_cast %100 : i32 to index
    %102 = memref.load %arg1[%101] : memref<32xi32, #tpu.memory_space<smem>>
    %103 = arith.index_cast %102 : i32 to index
    %c0_52 = arith.constant 0 : index
    %104 = vector.load %arg4[%103, %c0_52] : memref<256x128xf32, #tpu.memory_space<vmem>>, vector<1x128xf32>
    %105 = arith.index_cast %97 : i32 to index
    %c0_53 = arith.constant 0 : index
    %106 = vector.load %arg9[%105, %c0_53] : memref<8x128xf32, #tpu.memory_space<vmem>>, vector<1x128xf32>
    tpu.vector_store %arg9[%105, %c0_53], %104 {strides = array<i32>} : memref<8x128xf32, #tpu.memory_space<vmem>>, vector<1x128xf32>,
    %c8_i32_54 = arith.constant 8 : i32
    %107 = arith.muli %c0_i32_47, %c8_i32_54 : i32
    %c1_i32_55 = arith.constant 1 : i32
    %108 = arith.addi %107, %c1_i32_55 : i32
    %109 = arith.addi %0, %108 : i32
    %c4_i32_56 = arith.constant 4 : i32
    %110 = arith.muli %109, %c4_i32_56 : i32
    %c1_i32_57 = arith.constant 1 : i32
    %111 = arith.addi %110, %c1_i32_57 : i32
    %112 = arith.index_cast %111 : i32 to index
    %113 = memref.load %arg1[%112] : memref<32xi32, #tpu.memory_space<smem>>
    %114 = arith.index_cast %113 : i32 to index
    %c0_58 = arith.constant 0 : index
    %115 = vector.load %arg4[%114, %c0_58] : memref<256x128xf32, #tpu.memory_space<vmem>>, vector<1x128xf32>
    %116 = arith.index_cast %108 : i32 to index
    %c0_59 = arith.constant 0 : index
    %117 = vector.load %arg9[%116, %c0_59] : memref<8x128xf32, #tpu.memory_space<vmem>>, vector<1x128xf32>
    tpu.vector_store %arg9[%116, %c0_59], %115 {strides = array<i32>} : memref<8x128xf32, #tpu.memory_space<vmem>>, vector<1x128xf32>,
    %c8_i32_60 = arith.constant 8 : i32
    %118 = arith.muli %c0_i32_47, %c8_i32_60 : i32
    %c2_i32_61 = arith.constant 2 : i32
    %119 = arith.addi %118, %c2_i32_61 : i32
    %120 = arith.addi %0, %119 : i32
    %c4_i32_62 = arith.constant 4 : i32
    %121 = arith.muli %120, %c4_i32_62 : i32
    %c1_i32_63 = arith.constant 1 : i32
    %122 = arith.addi %121, %c1_i32_63 : i32
    %123 = arith.index_cast %122 : i32 to index
    %124 = memref.load %arg1[%123] : memref<32xi32, #tpu.memory_space<smem>>
    %125 = arith.index_cast %124 : i32 to index
    %c0_64 = arith.constant 0 : index
    %126 = vector.load %arg4[%125, %c0_64] : memref<256x128xf32, #tpu.memory_space<vmem>>, vector<1x128xf32>
    %127 = arith.index_cast %119 : i32 to index
    %c0_65 = arith.constant 0 : index
    %128 = vector.load %arg9[%127, %c0_65] : memref<8x128xf32, #tpu.memory_space<vmem>>, vector<1x128xf32>
    tpu.vector_store %arg9[%127, %c0_65], %126 {strides = array<i32>} : memref<8x128xf32, #tpu.memory_space<vmem>>, vector<1x128xf32>,
    %c8_i32_66 = arith.constant 8 : i32
    %129 = arith.muli %c0_i32_47, %c8_i32_66 : i32
    %c3_i32_67 = arith.constant 3 : i32
    %130 = arith.addi %129, %c3_i32_67 : i32
    %131 = arith.addi %0, %130 : i32
    %c4_i32_68 = arith.constant 4 : i32
    %132 = arith.muli %131, %c4_i32_68 : i32
    %c1_i32_69 = arith.constant 1 : i32
    %133 = arith.addi %132, %c1_i32_69 : i32
    %134 = arith.index_cast %133 : i32 to index
    %135 = memref.load %arg1[%134] : memref<32xi32, #tpu.memory_space<smem>>
    %136 = arith.index_cast %135 : i32 to index
    %c0_70 = arith.constant 0 : index
    %137 = vector.load %arg4[%136, %c0_70] : memref<256x128xf32, #tpu.memory_space<vmem>>, vector<1x128xf32>
    %138 = arith.index_cast %130 : i32 to index
    %c0_71 = arith.constant 0 : index
    %139 = vector.load %arg9[%138, %c0_71] : memref<8x128xf32, #tpu.memory_space<vmem>>, vector<1x128xf32>
    tpu.vector_store %arg9[%138, %c0_71], %137 {strides = array<i32>} : memref<8x128xf32, #tpu.memory_space<vmem>>, vector<1x128xf32>,
    %c8_i32_72 = arith.constant 8 : i32
    %140 = arith.muli %c0_i32_47, %c8_i32_72 : i32
    %c4_i32_73 = arith.constant 4 : i32
    %141 = arith.addi %140, %c4_i32_73 : i32
    %142 = arith.addi %0, %141 : i32
    %c4_i32_74 = arith.constant 4 : i32
    %143 = arith.muli %142, %c4_i32_74 : i32
    %c1_i32_75 = arith.constant 1 : i32
    %144 = arith.addi %143, %c1_i32_75 : i32
    %145 = arith.index_cast %144 : i32 to index
    %146 = memref.load %arg1[%145] : memref<32xi32, #tpu.memory_space<smem>>
    %147 = arith.index_cast %146 : i32 to index
    %c0_76 = arith.constant 0 : index
    %148 = vector.load %arg4[%147, %c0_76] : memref<256x128xf32, #tpu.memory_space<vmem>>, vector<1x128xf32>
    %149 = arith.index_cast %141 : i32 to index
    %c0_77 = arith.constant 0 : index
    %150 = vector.load %arg9[%149, %c0_77] : memref<8x128xf32, #tpu.memory_space<vmem>>, vector<1x128xf32>
    tpu.vector_store %arg9[%149, %c0_77], %148 {strides = array<i32>} : memref<8x128xf32, #tpu.memory_space<vmem>>, vector<1x128xf32>,
    %c8_i32_78 = arith.constant 8 : i32
    %151 = arith.muli %c0_i32_47, %c8_i32_78 : i32
    %c5_i32_79 = arith.constant 5 : i32
    %152 = arith.addi %151, %c5_i32_79 : i32
    %153 = arith.addi %0, %152 : i32
    %c4_i32_80 = arith.constant 4 : i32
    %154 = arith.muli %153, %c4_i32_80 : i32
    %c1_i32_81 = arith.constant 1 : i32
    %155 = arith.addi %154, %c1_i32_81 : i32
    %156 = arith.index_cast %155 : i32 to index
    %157 = memref.load %arg1[%156] : memref<32xi32, #tpu.memory_space<smem>>
    %158 = arith.index_cast %157 : i32 to index
    %c0_82 = arith.constant 0 : index
    %159 = vector.load %arg4[%158, %c0_82] : memref<256x128xf32, #tpu.memory_space<vmem>>, vector<1x128xf32>
    %160 = arith.index_cast %152 : i32 to index
    %c0_83 = arith.constant 0 : index
    %161 = vector.load %arg9[%160, %c0_83] : memref<8x128xf32, #tpu.memory_space<vmem>>, vector<1x128xf32>
    tpu.vector_store %arg9[%160, %c0_83], %159 {strides = array<i32>} : memref<8x128xf32, #tpu.memory_space<vmem>>, vector<1x128xf32>,
    %c8_i32_84 = arith.constant 8 : i32
    %162 = arith.muli %c0_i32_47, %c8_i32_84 : i32
    %c6_i32_85 = arith.constant 6 : i32
    %163 = arith.addi %162, %c6_i32_85 : i32
    %164 = arith.addi %0, %163 : i32
    %c4_i32_86 = arith.constant 4 : i32
    %165 = arith.muli %164, %c4_i32_86 : i32
    %c1_i32_87 = arith.constant 1 : i32
    %166 = arith.addi %165, %c1_i32_87 : i32
    %167 = arith.index_cast %166 : i32 to index
    %168 = memref.load %arg1[%167] : memref<32xi32, #tpu.memory_space<smem>>
    %169 = arith.index_cast %168 : i32 to index
    %c0_88 = arith.constant 0 : index
    %170 = vector.load %arg4[%169, %c0_88] : memref<256x128xf32, #tpu.memory_space<vmem>>, vector<1x128xf32>
    %171 = arith.index_cast %163 : i32 to index
    %c0_89 = arith.constant 0 : index
    %172 = vector.load %arg9[%171, %c0_89] : memref<8x128xf32, #tpu.memory_space<vmem>>, vector<1x128xf32>
    tpu.vector_store %arg9[%171, %c0_89], %170 {strides = array<i32>} : memref<8x128xf32, #tpu.memory_space<vmem>>, vector<1x128xf32>,
    %c8_i32_90 = arith.constant 8 : i32
    %173 = arith.muli %c0_i32_47, %c8_i32_90 : i32
    %c7_i32_91 = arith.constant 7 : i32
    %174 = arith.addi %173, %c7_i32_91 : i32
    %175 = arith.addi %0, %174 : i32
    %c4_i32_92 = arith.constant 4 : i32
    %176 = arith.muli %175, %c4_i32_92 : i32
    %c1_i32_93 = arith.constant 1 : i32
    %177 = arith.addi %176, %c1_i32_93 : i32
    %178 = arith.index_cast %177 : i32 to index
    %179 = memref.load %arg1[%178] : memref<32xi32, #tpu.memory_space<smem>>
    %180 = arith.index_cast %179 : i32 to index
    %c0_94 = arith.constant 0 : index
    %181 = vector.load %arg4[%180, %c0_94] : memref<256x128xf32, #tpu.memory_space<vmem>>, vector<1x128xf32>
    %182 = arith.index_cast %174 : i32 to index
    %c0_95 = arith.constant 0 : index
    %183 = vector.load %arg9[%182, %c0_95] : memref<8x128xf32, #tpu.memory_space<vmem>>, vector<1x128xf32>
    tpu.vector_store %arg9[%182, %c0_95], %181 {strides = array<i32>} : memref<8x128xf32, #tpu.memory_space<vmem>>, vector<1x128xf32>,
    %c1_i32_96 = arith.constant 1 : i32
    %c0_97 = arith.constant 0 : index
    %c0_98 = arith.constant 0 : index
    %184 = vector.load %arg9[%c0_97, %c0_98] : memref<8x128xf32, #tpu.memory_space<vmem>>, vector<8x128xf32>
    %cst_99 = arith.constant 0.000000e+00 : f32
    %185 = vector.broadcast %cst_99 : f32 to vector<8x128xf32>
    %186 = arith.cmpf one, %184, %185 : vector<8x128xf32>
    %187 = arith.extui %186 : vector<8x128xi1> to vector<8x128xi32>
    %188 = arith.sitofp %187 : vector<8x128xi32> to vector<8x128xf32>
    %c0_100 = arith.constant 0 : index
    %c0_101 = arith.constant 0 : index
    %189 = vector.load %arg10[%c0_100, %c0_101] : memref<8x128xf32, #tpu.memory_space<vmem>>, vector<8x128xf32>
    %190 = arith.addf %189, %184 : vector<8x128xf32>
    %c0_102 = arith.constant 0 : index
    %c0_103 = arith.constant 0 : index
    %191 = vector.load %arg10[%c0_102, %c0_103] : memref<8x128xf32, #tpu.memory_space<vmem>>, vector<8x128xf32>
    tpu.vector_store %arg10[%c0_102, %c0_103], %190 {strides = array<i32>} : memref<8x128xf32, #tpu.memory_space<vmem>>, vector<8x128xf32>,
    %c0_104 = arith.constant 0 : index
    %c0_105 = arith.constant 0 : index
    %192 = vector.load %arg11[%c0_104, %c0_105] : memref<8x128xf32, #tpu.memory_space<vmem>>, vector<8x128xf32>
    %193 = arith.addf %192, %188 : vector<8x128xf32>
    %c0_106 = arith.constant 0 : index
    %c0_107 = arith.constant 0 : index
    %194 = vector.load %arg11[%c0_106, %c0_107] : memref<8x128xf32, #tpu.memory_space<vmem>>, vector<8x128xf32>
    tpu.vector_store %arg11[%c0_106, %c0_107], %193 {strides = array<i32>} : memref<8x128xf32, #tpu.memory_space<vmem>>, vector<8x128xf32>,
    %c0_i32_108 = arith.constant 0 : i32
    %c8_i32_109 = arith.constant 8 : i32
    %195 = arith.muli %c0_i32_108, %c8_i32_109 : i32
    %c0_i32_110 = arith.constant 0 : i32
    %196 = arith.addi %195, %c0_i32_110 : i32
    %197 = arith.addi %0, %196 : i32
    %c4_i32_111 = arith.constant 4 : i32
    %198 = arith.muli %197, %c4_i32_111 : i32
    %c2_i32_112 = arith.constant 2 : i32
    %199 = arith.addi %198, %c2_i32_112 : i32
    %200 = arith.index_cast %199 : i32 to index
    %201 = memref.load %arg1[%200] : memref<32xi32, #tpu.memory_space<smem>>
    %202 = arith.index_cast %201 : i32 to index
    %c0_113 = arith.constant 0 : index
    %203 = vector.load %arg4[%202, %c0_113] : memref<256x128xf32, #tpu.memory_space<vmem>>, vector<1x128xf32>
    %204 = arith.index_cast %196 : i32 to index
    %c0_114 = arith.constant 0 : index
    %205 = vector.load %arg9[%204, %c0_114] : memref<8x128xf32, #tpu.memory_space<vmem>>, vector<1x128xf32>
    tpu.vector_store %arg9[%204, %c0_114], %203 {strides = array<i32>} : memref<8x128xf32, #tpu.memory_space<vmem>>, vector<1x128xf32>,
    %c8_i32_115 = arith.constant 8 : i32
    %206 = arith.muli %c0_i32_108, %c8_i32_115 : i32
    %c1_i32_116 = arith.constant 1 : i32
    %207 = arith.addi %206, %c1_i32_116 : i32
    %208 = arith.addi %0, %207 : i32
    %c4_i32_117 = arith.constant 4 : i32
    %209 = arith.muli %208, %c4_i32_117 : i32
    %c2_i32_118 = arith.constant 2 : i32
    %210 = arith.addi %209, %c2_i32_118 : i32
    %211 = arith.index_cast %210 : i32 to index
    %212 = memref.load %arg1[%211] : memref<32xi32, #tpu.memory_space<smem>>
    %213 = arith.index_cast %212 : i32 to index
    %c0_119 = arith.constant 0 : index
    %214 = vector.load %arg4[%213, %c0_119] : memref<256x128xf32, #tpu.memory_space<vmem>>, vector<1x128xf32>
    %215 = arith.index_cast %207 : i32 to index
    %c0_120 = arith.constant 0 : index
    %216 = vector.load %arg9[%215, %c0_120] : memref<8x128xf32, #tpu.memory_space<vmem>>, vector<1x128xf32>
    tpu.vector_store %arg9[%215, %c0_120], %214 {strides = array<i32>} : memref<8x128xf32, #tpu.memory_space<vmem>>, vector<1x128xf32>,
    %c8_i32_121 = arith.constant 8 : i32
    %217 = arith.muli %c0_i32_108, %c8_i32_121 : i32
    %c2_i32_122 = arith.constant 2 : i32
    %218 = arith.addi %217, %c2_i32_122 : i32
    %219 = arith.addi %0, %218 : i32
    %c4_i32_123 = arith.constant 4 : i32
    %220 = arith.muli %219, %c4_i32_123 : i32
    %c2_i32_124 = arith.constant 2 : i32
    %221 = arith.addi %220, %c2_i32_124 : i32
    %222 = arith.index_cast %221 : i32 to index
    %223 = memref.load %arg1[%222] : memref<32xi32, #tpu.memory_space<smem>>
    %224 = arith.index_cast %223 : i32 to index
    %c0_125 = arith.constant 0 : index
    %225 = vector.load %arg4[%224, %c0_125] : memref<256x128xf32, #tpu.memory_space<vmem>>, vector<1x128xf32>
    %226 = arith.index_cast %218 : i32 to index
    %c0_126 = arith.constant 0 : index
    %227 = vector.load %arg9[%226, %c0_126] : memref<8x128xf32, #tpu.memory_space<vmem>>, vector<1x128xf32>
    tpu.vector_store %arg9[%226, %c0_126], %225 {strides = array<i32>} : memref<8x128xf32, #tpu.memory_space<vmem>>, vector<1x128xf32>,
    %c8_i32_127 = arith.constant 8 : i32
    %228 = arith.muli %c0_i32_108, %c8_i32_127 : i32
    %c3_i32_128 = arith.constant 3 : i32
    %229 = arith.addi %228, %c3_i32_128 : i32
    %230 = arith.addi %0, %229 : i32
    %c4_i32_129 = arith.constant 4 : i32
    %231 = arith.muli %230, %c4_i32_129 : i32
    %c2_i32_130 = arith.constant 2 : i32
    %232 = arith.addi %231, %c2_i32_130 : i32
    %233 = arith.index_cast %232 : i32 to index
    %234 = memref.load %arg1[%233] : memref<32xi32, #tpu.memory_space<smem>>
    %235 = arith.index_cast %234 : i32 to index
    %c0_131 = arith.constant 0 : index
    %236 = vector.load %arg4[%235, %c0_131] : memref<256x128xf32, #tpu.memory_space<vmem>>, vector<1x128xf32>
    %237 = arith.index_cast %229 : i32 to index
    %c0_132 = arith.constant 0 : index
    %238 = vector.load %arg9[%237, %c0_132] : memref<8x128xf32, #tpu.memory_space<vmem>>, vector<1x128xf32>
    tpu.vector_store %arg9[%237, %c0_132], %236 {strides = array<i32>} : memref<8x128xf32, #tpu.memory_space<vmem>>, vector<1x128xf32>,
    %c8_i32_133 = arith.constant 8 : i32
    %239 = arith.muli %c0_i32_108, %c8_i32_133 : i32
    %c4_i32_134 = arith.constant 4 : i32
    %240 = arith.addi %239, %c4_i32_134 : i32
    %241 = arith.addi %0, %240 : i32
    %c4_i32_135 = arith.constant 4 : i32
    %242 = arith.muli %241, %c4_i32_135 : i32
    %c2_i32_136 = arith.constant 2 : i32
    %243 = arith.addi %242, %c2_i32_136 : i32
    %244 = arith.index_cast %243 : i32 to index
    %245 = memref.load %arg1[%244] : memref<32xi32, #tpu.memory_space<smem>>
    %246 = arith.index_cast %245 : i32 to index
    %c0_137 = arith.constant 0 : index
    %247 = vector.load %arg4[%246, %c0_137] : memref<256x128xf32, #tpu.memory_space<vmem>>, vector<1x128xf32>
    %248 = arith.index_cast %240 : i32 to index
    %c0_138 = arith.constant 0 : index
    %249 = vector.load %arg9[%248, %c0_138] : memref<8x128xf32, #tpu.memory_space<vmem>>, vector<1x128xf32>
    tpu.vector_store %arg9[%248, %c0_138], %247 {strides = array<i32>} : memref<8x128xf32, #tpu.memory_space<vmem>>, vector<1x128xf32>,
    %c8_i32_139 = arith.constant 8 : i32
    %250 = arith.muli %c0_i32_108, %c8_i32_139 : i32
    %c5_i32_140 = arith.constant 5 : i32
    %251 = arith.addi %250, %c5_i32_140 : i32
    %252 = arith.addi %0, %251 : i32
    %c4_i32_141 = arith.constant 4 : i32
    %253 = arith.muli %252, %c4_i32_141 : i32
    %c2_i32_142 = arith.constant 2 : i32
    %254 = arith.addi %253, %c2_i32_142 : i32
    %255 = arith.index_cast %254 : i32 to index
    %256 = memref.load %arg1[%255] : memref<32xi32, #tpu.memory_space<smem>>
    %257 = arith.index_cast %256 : i32 to index
    %c0_143 = arith.constant 0 : index
    %258 = vector.load %arg4[%257, %c0_143] : memref<256x128xf32, #tpu.memory_space<vmem>>, vector<1x128xf32>
    %259 = arith.index_cast %251 : i32 to index
    %c0_144 = arith.constant 0 : index
    %260 = vector.load %arg9[%259, %c0_144] : memref<8x128xf32, #tpu.memory_space<vmem>>, vector<1x128xf32>
    tpu.vector_store %arg9[%259, %c0_144], %258 {strides = array<i32>} : memref<8x128xf32, #tpu.memory_space<vmem>>, vector<1x128xf32>,
    %c8_i32_145 = arith.constant 8 : i32
    %261 = arith.muli %c0_i32_108, %c8_i32_145 : i32
    %c6_i32_146 = arith.constant 6 : i32
    %262 = arith.addi %261, %c6_i32_146 : i32
    %263 = arith.addi %0, %262 : i32
    %c4_i32_147 = arith.constant 4 : i32
    %264 = arith.muli %263, %c4_i32_147 : i32
    %c2_i32_148 = arith.constant 2 : i32
    %265 = arith.addi %264, %c2_i32_148 : i32
    %266 = arith.index_cast %265 : i32 to index
    %267 = memref.load %arg1[%266] : memref<32xi32, #tpu.memory_space<smem>>
    %268 = arith.index_cast %267 : i32 to index
    %c0_149 = arith.constant 0 : index
    %269 = vector.load %arg4[%268, %c0_149] : memref<256x128xf32, #tpu.memory_space<vmem>>, vector<1x128xf32>
    %270 = arith.index_cast %262 : i32 to index
    %c0_150 = arith.constant 0 : index
    %271 = vector.load %arg9[%270, %c0_150] : memref<8x128xf32, #tpu.memory_space<vmem>>, vector<1x128xf32>
    tpu.vector_store %arg9[%270, %c0_150], %269 {strides = array<i32>} : memref<8x128xf32, #tpu.memory_space<vmem>>, vector<1x128xf32>,
    %c8_i32_151 = arith.constant 8 : i32
    %272 = arith.muli %c0_i32_108, %c8_i32_151 : i32
    %c7_i32_152 = arith.constant 7 : i32
    %273 = arith.addi %272, %c7_i32_152 : i32
    %274 = arith.addi %0, %273 : i32
    %c4_i32_153 = arith.constant 4 : i32
    %275 = arith.muli %274, %c4_i32_153 : i32
    %c2_i32_154 = arith.constant 2 : i32
    %276 = arith.addi %275, %c2_i32_154 : i32
    %277 = arith.index_cast %276 : i32 to index
    %278 = memref.load %arg1[%277] : memref<32xi32, #tpu.memory_space<smem>>
    %279 = arith.index_cast %278 : i32 to index
    %c0_155 = arith.constant 0 : index
    %280 = vector.load %arg4[%279, %c0_155] : memref<256x128xf32, #tpu.memory_space<vmem>>, vector<1x128xf32>
    %281 = arith.index_cast %273 : i32 to index
    %c0_156 = arith.constant 0 : index
    %282 = vector.load %arg9[%281, %c0_156] : memref<8x128xf32, #tpu.memory_space<vmem>>, vector<1x128xf32>
    tpu.vector_store %arg9[%281, %c0_156], %280 {strides = array<i32>} : memref<8x128xf32, #tpu.memory_space<vmem>>, vector<1x128xf32>,
    %c1_i32_157 = arith.constant 1 : i32
    %c0_158 = arith.constant 0 : index
    %c0_159 = arith.constant 0 : index
    %283 = vector.load %arg9[%c0_158, %c0_159] : memref<8x128xf32, #tpu.memory_space<vmem>>, vector<8x128xf32>
    %cst_160 = arith.constant 0.000000e+00 : f32
    %284 = vector.broadcast %cst_160 : f32 to vector<8x128xf32>
    %285 = arith.cmpf one, %283, %284 : vector<8x128xf32>
    %286 = arith.extui %285 : vector<8x128xi1> to vector<8x128xi32>
    %287 = arith.sitofp %286 : vector<8x128xi32> to vector<8x128xf32>
    %c0_161 = arith.constant 0 : index
    %c0_162 = arith.constant 0 : index
    %288 = vector.load %arg10[%c0_161, %c0_162] : memref<8x128xf32, #tpu.memory_space<vmem>>, vector<8x128xf32>
    %289 = arith.addf %288, %283 : vector<8x128xf32>
    %c0_163 = arith.constant 0 : index
    %c0_164 = arith.constant 0 : index
    %290 = vector.load %arg10[%c0_163, %c0_164] : memref<8x128xf32, #tpu.memory_space<vmem>>, vector<8x128xf32>
    tpu.vector_store %arg10[%c0_163, %c0_164], %289 {strides = array<i32>} : memref<8x128xf32, #tpu.memory_space<vmem>>, vector<8x128xf32>,
    %c0_165 = arith.constant 0 : index
    %c0_166 = arith.constant 0 : index
    %291 = vector.load %arg11[%c0_165, %c0_166] : memref<8x128xf32, #tpu.memory_space<vmem>>, vector<8x128xf32>
    %292 = arith.addf %291, %287 : vector<8x128xf32>
    %c0_167 = arith.constant 0 : index
    %c0_168 = arith.constant 0 : index
    %293 = vector.load %arg11[%c0_167, %c0_168] : memref<8x128xf32, #tpu.memory_space<vmem>>, vector<8x128xf32>
    tpu.vector_store %arg11[%c0_167, %c0_168], %292 {strides = array<i32>} : memref<8x128xf32, #tpu.memory_space<vmem>>, vector<8x128xf32>,
    %c0_i32_169 = arith.constant 0 : i32
    %c8_i32_170 = arith.constant 8 : i32
    %294 = arith.muli %c0_i32_169, %c8_i32_170 : i32
    %c0_i32_171 = arith.constant 0 : i32
    %295 = arith.addi %294, %c0_i32_171 : i32
    %296 = arith.addi %0, %295 : i32
    %c4_i32_172 = arith.constant 4 : i32
    %297 = arith.muli %296, %c4_i32_172 : i32
    %c3_i32_173 = arith.constant 3 : i32
    %298 = arith.addi %297, %c3_i32_173 : i32
    %299 = arith.index_cast %298 : i32 to index
    %300 = memref.load %arg1[%299] : memref<32xi32, #tpu.memory_space<smem>>
    %301 = arith.index_cast %300 : i32 to index
    %c0_174 = arith.constant 0 : index
    %302 = vector.load %arg4[%301, %c0_174] : memref<256x128xf32, #tpu.memory_space<vmem>>, vector<1x128xf32>
    %303 = arith.index_cast %295 : i32 to index
    %c0_175 = arith.constant 0 : index
    %304 = vector.load %arg9[%303, %c0_175] : memref<8x128xf32, #tpu.memory_space<vmem>>, vector<1x128xf32>
    tpu.vector_store %arg9[%303, %c0_175], %302 {strides = array<i32>} : memref<8x128xf32, #tpu.memory_space<vmem>>, vector<1x128xf32>,
    %c8_i32_176 = arith.constant 8 : i32
    %305 = arith.muli %c0_i32_169, %c8_i32_176 : i32
    %c1_i32_177 = arith.constant 1 : i32
    %306 = arith.addi %305, %c1_i32_177 : i32
    %307 = arith.addi %0, %306 : i32
    %c4_i32_178 = arith.constant 4 : i32
    %308 = arith.muli %307, %c4_i32_178 : i32
    %c3_i32_179 = arith.constant 3 : i32
    %309 = arith.addi %308, %c3_i32_179 : i32
    %310 = arith.index_cast %309 : i32 to index
    %311 = memref.load %arg1[%310] : memref<32xi32, #tpu.memory_space<smem>>
    %312 = arith.index_cast %311 : i32 to index
    %c0_180 = arith.constant 0 : index
    %313 = vector.load %arg4[%312, %c0_180] : memref<256x128xf32, #tpu.memory_space<vmem>>, vector<1x128xf32>
    %314 = arith.index_cast %306 : i32 to index
    %c0_181 = arith.constant 0 : index
    %315 = vector.load %arg9[%314, %c0_181] : memref<8x128xf32, #tpu.memory_space<vmem>>, vector<1x128xf32>
    tpu.vector_store %arg9[%314, %c0_181], %313 {strides = array<i32>} : memref<8x128xf32, #tpu.memory_space<vmem>>, vector<1x128xf32>,
    %c8_i32_182 = arith.constant 8 : i32
    %316 = arith.muli %c0_i32_169, %c8_i32_182 : i32
    %c2_i32_183 = arith.constant 2 : i32
    %317 = arith.addi %316, %c2_i32_183 : i32
    %318 = arith.addi %0, %317 : i32
    %c4_i32_184 = arith.constant 4 : i32
    %319 = arith.muli %318, %c4_i32_184 : i32
    %c3_i32_185 = arith.constant 3 : i32
    %320 = arith.addi %319, %c3_i32_185 : i32
    %321 = arith.index_cast %320 : i32 to index
    %322 = memref.load %arg1[%321] : memref<32xi32, #tpu.memory_space<smem>>
    %323 = arith.index_cast %322 : i32 to index
    %c0_186 = arith.constant 0 : index
    %324 = vector.load %arg4[%323, %c0_186] : memref<256x128xf32, #tpu.memory_space<vmem>>, vector<1x128xf32>
    %325 = arith.index_cast %317 : i32 to index
    %c0_187 = arith.constant 0 : index
    %326 = vector.load %arg9[%325, %c0_187] : memref<8x128xf32, #tpu.memory_space<vmem>>, vector<1x128xf32>
    tpu.vector_store %arg9[%325, %c0_187], %324 {strides = array<i32>} : memref<8x128xf32, #tpu.memory_space<vmem>>, vector<1x128xf32>,
    %c8_i32_188 = arith.constant 8 : i32
    %327 = arith.muli %c0_i32_169, %c8_i32_188 : i32
    %c3_i32_189 = arith.constant 3 : i32
    %328 = arith.addi %327, %c3_i32_189 : i32
    %329 = arith.addi %0, %328 : i32
    %c4_i32_190 = arith.constant 4 : i32
    %330 = arith.muli %329, %c4_i32_190 : i32
    %c3_i32_191 = arith.constant 3 : i32
    %331 = arith.addi %330, %c3_i32_191 : i32
    %332 = arith.index_cast %331 : i32 to index
    %333 = memref.load %arg1[%332] : memref<32xi32, #tpu.memory_space<smem>>
    %334 = arith.index_cast %333 : i32 to index
    %c0_192 = arith.constant 0 : index
    %335 = vector.load %arg4[%334, %c0_192] : memref<256x128xf32, #tpu.memory_space<vmem>>, vector<1x128xf32>
    %336 = arith.index_cast %328 : i32 to index
    %c0_193 = arith.constant 0 : index
    %337 = vector.load %arg9[%336, %c0_193] : memref<8x128xf32, #tpu.memory_space<vmem>>, vector<1x128xf32>
    tpu.vector_store %arg9[%336, %c0_193], %335 {strides = array<i32>} : memref<8x128xf32, #tpu.memory_space<vmem>>, vector<1x128xf32>,
    %c8_i32_194 = arith.constant 8 : i32
    %338 = arith.muli %c0_i32_169, %c8_i32_194 : i32
    %c4_i32_195 = arith.constant 4 : i32
    %339 = arith.addi %338, %c4_i32_195 : i32
    %340 = arith.addi %0, %339 : i32
    %c4_i32_196 = arith.constant 4 : i32
    %341 = arith.muli %340, %c4_i32_196 : i32
    %c3_i32_197 = arith.constant 3 : i32
    %342 = arith.addi %341, %c3_i32_197 : i32
    %343 = arith.index_cast %342 : i32 to index
    %344 = memref.load %arg1[%343] : memref<32xi32, #tpu.memory_space<smem>>
    %345 = arith.index_cast %344 : i32 to index
    %c0_198 = arith.constant 0 : index
    %346 = vector.load %arg4[%345, %c0_198] : memref<256x128xf32, #tpu.memory_space<vmem>>, vector<1x128xf32>
    %347 = arith.index_cast %339 : i32 to index
    %c0_199 = arith.constant 0 : index
    %348 = vector.load %arg9[%347, %c0_199] : memref<8x128xf32, #tpu.memory_space<vmem>>, vector<1x128xf32>
    tpu.vector_store %arg9[%347, %c0_199], %346 {strides = array<i32>} : memref<8x128xf32, #tpu.memory_space<vmem>>, vector<1x128xf32>,
    %c8_i32_200 = arith.constant 8 : i32
    %349 = arith.muli %c0_i32_169, %c8_i32_200 : i32
    %c5_i32_201 = arith.constant 5 : i32
    %350 = arith.addi %349, %c5_i32_201 : i32
    %351 = arith.addi %0, %350 : i32
    %c4_i32_202 = arith.constant 4 : i32
    %352 = arith.muli %351, %c4_i32_202 : i32
    %c3_i32_203 = arith.constant 3 : i32
    %353 = arith.addi %352, %c3_i32_203 : i32
    %354 = arith.index_cast %353 : i32 to index
    %355 = memref.load %arg1[%354] : memref<32xi32, #tpu.memory_space<smem>>
    %356 = arith.index_cast %355 : i32 to index
    %c0_204 = arith.constant 0 : index
    %357 = vector.load %arg4[%356, %c0_204] : memref<256x128xf32, #tpu.memory_space<vmem>>, vector<1x128xf32>
    %358 = arith.index_cast %350 : i32 to index
    %c0_205 = arith.constant 0 : index
    %359 = vector.load %arg9[%358, %c0_205] : memref<8x128xf32, #tpu.memory_space<vmem>>, vector<1x128xf32>
    tpu.vector_store %arg9[%358, %c0_205], %357 {strides = array<i32>} : memref<8x128xf32, #tpu.memory_space<vmem>>, vector<1x128xf32>,
    %c8_i32_206 = arith.constant 8 : i32
    %360 = arith.muli %c0_i32_169, %c8_i32_206 : i32
    %c6_i32_207 = arith.constant 6 : i32
    %361 = arith.addi %360, %c6_i32_207 : i32
    %362 = arith.addi %0, %361 : i32
    %c4_i32_208 = arith.constant 4 : i32
    %363 = arith.muli %362, %c4_i32_208 : i32
    %c3_i32_209 = arith.constant 3 : i32
    %364 = arith.addi %363, %c3_i32_209 : i32
    %365 = arith.index_cast %364 : i32 to index
    %366 = memref.load %arg1[%365] : memref<32xi32, #tpu.memory_space<smem>>
    %367 = arith.index_cast %366 : i32 to index
    %c0_210 = arith.constant 0 : index
    %368 = vector.load %arg4[%367, %c0_210] : memref<256x128xf32, #tpu.memory_space<vmem>>, vector<1x128xf32>
    %369 = arith.index_cast %361 : i32 to index
    %c0_211 = arith.constant 0 : index
    %370 = vector.load %arg9[%369, %c0_211] : memref<8x128xf32, #tpu.memory_space<vmem>>, vector<1x128xf32>
    tpu.vector_store %arg9[%369, %c0_211], %368 {strides = array<i32>} : memref<8x128xf32, #tpu.memory_space<vmem>>, vector<1x128xf32>,
    %c8_i32_212 = arith.constant 8 : i32
    %371 = arith.muli %c0_i32_169, %c8_i32_212 : i32
    %c7_i32_213 = arith.constant 7 : i32
    %372 = arith.addi %371, %c7_i32_213 : i32
    %373 = arith.addi %0, %372 : i32
    %c4_i32_214 = arith.constant 4 : i32
    %374 = arith.muli %373, %c4_i32_214 : i32
    %c3_i32_215 = arith.constant 3 : i32
    %375 = arith.addi %374, %c3_i32_215 : i32
    %376 = arith.index_cast %375 : i32 to index
    %377 = memref.load %arg1[%376] : memref<32xi32, #tpu.memory_space<smem>>
    %378 = arith.index_cast %377 : i32 to index
    %c0_216 = arith.constant 0 : index
    %379 = vector.load %arg4[%378, %c0_216] : memref<256x128xf32, #tpu.memory_space<vmem>>, vector<1x128xf32>
    %380 = arith.index_cast %372 : i32 to index
    %c0_217 = arith.constant 0 : index
    %381 = vector.load %arg9[%380, %c0_217] : memref<8x128xf32, #tpu.memory_space<vmem>>, vector<1x128xf32>
    tpu.vector_store %arg9[%380, %c0_217], %379 {strides = array<i32>} : memref<8x128xf32, #tpu.memory_space<vmem>>, vector<1x128xf32>,
    %c1_i32_218 = arith.constant 1 : i32
    %c0_219 = arith.constant 0 : index
    %c0_220 = arith.constant 0 : index
    %382 = vector.load %arg9[%c0_219, %c0_220] : memref<8x128xf32, #tpu.memory_space<vmem>>, vector<8x128xf32>
    %cst_221 = arith.constant 0.000000e+00 : f32
    %383 = vector.broadcast %cst_221 : f32 to vector<8x128xf32>
    %384 = arith.cmpf one, %382, %383 : vector<8x128xf32>
    %385 = arith.extui %384 : vector<8x128xi1> to vector<8x128xi32>
    %386 = arith.sitofp %385 : vector<8x128xi32> to vector<8x128xf32>
    %c0_222 = arith.constant 0 : index
    %c0_223 = arith.constant 0 : index
    %387 = vector.load %arg10[%c0_222, %c0_223] : memref<8x128xf32, #tpu.memory_space<vmem>>, vector<8x128xf32>
    %388 = arith.addf %387, %382 : vector<8x128xf32>
    %c0_224 = arith.constant 0 : index
    %c0_225 = arith.constant 0 : index
    %389 = vector.load %arg10[%c0_224, %c0_225] : memref<8x128xf32, #tpu.memory_space<vmem>>, vector<8x128xf32>
    tpu.vector_store %arg10[%c0_224, %c0_225], %388 {strides = array<i32>} : memref<8x128xf32, #tpu.memory_space<vmem>>, vector<8x128xf32>,
    %c0_226 = arith.constant 0 : index
    %c0_227 = arith.constant 0 : index
    %390 = vector.load %arg11[%c0_226, %c0_227] : memref<8x128xf32, #tpu.memory_space<vmem>>, vector<8x128xf32>
    %391 = arith.addf %390, %386 : vector<8x128xf32>
    %c0_228 = arith.constant 0 : index
    %c0_229 = arith.constant 0 : index
    %392 = vector.load %arg11[%c0_228, %c0_229] : memref<8x128xf32, #tpu.memory_space<vmem>>, vector<8x128xf32>
    tpu.vector_store %arg11[%c0_228, %c0_229], %391 {strides = array<i32>} : memref<8x128xf32, #tpu.memory_space<vmem>>, vector<8x128xf32>,
    %c0_230 = arith.constant 0 : index
    %c0_231 = arith.constant 0 : index
    %393 = vector.load %arg10[%c0_230, %c0_231] : memref<8x128xf32, #tpu.memory_space<vmem>>, vector<8x128xf32>
    %c0_232 = arith.constant 0 : index
    %c0_233 = arith.constant 0 : index
    %394 = vector.load %arg11[%c0_232, %c0_233] : memref<8x128xf32, #tpu.memory_space<vmem>>, vector<8x128xf32>
    %cst_234 = arith.constant 1.000000e+00 : f32
    %395 = vector.broadcast %cst_234 : f32 to vector<8x128xf32>
    %396 = arith.maximumf %394, %395 : vector<8x128xf32>
    %397 = arith.divf %393, %396 : vector<8x128xf32>
    %c0_235 = arith.constant 0 : index
    %c0_236 = arith.constant 0 : index
    %398 = vector.load %arg6[%c0_235, %c0_236] : memref<8x128xf32, #tpu.memory_space<vmem>>, vector<8x128xf32>
    tpu.vector_store %arg6[%c0_235, %c0_236], %397 {strides = array<i32>} : memref<8x128xf32, #tpu.memory_space<vmem>>, vector<8x128xf32>,
    %c0_i32_237 = arith.constant 0 : i32
    %c8_i32_238 = arith.constant 8 : i32
    %399 = arith.muli %c0_i32_237, %c8_i32_238 : i32
    %c0_i32_239 = arith.constant 0 : i32
    %400 = arith.addi %399, %c0_i32_239 : i32
    %401 = arith.addi %0, %400 : i32
    %c4_i32_240 = arith.constant 4 : i32
    %402 = arith.muli %401, %c4_i32_240 : i32
    %c0_i32_241 = arith.constant 0 : i32
    %403 = arith.addi %402, %c0_i32_241 : i32
    %404 = arith.index_cast %403 : i32 to index
    %405 = memref.load %arg2[%404] : memref<32xi32, #tpu.memory_space<smem>>
    %406 = arith.index_cast %405 : i32 to index
    %c0_242 = arith.constant 0 : index
    %407 = vector.load %arg5[%406, %c0_242] : memref<256x128xf32, #tpu.memory_space<vmem>>, vector<1x128xf32>
    %408 = arith.index_cast %400 : i32 to index
    %c0_243 = arith.constant 0 : index
    %409 = vector.load %arg9[%408, %c0_243] : memref<8x128xf32, #tpu.memory_space<vmem>>, vector<1x128xf32>
    tpu.vector_store %arg9[%408, %c0_243], %407 {strides = array<i32>} : memref<8x128xf32, #tpu.memory_space<vmem>>, vector<1x128xf32>,
    %c8_i32_244 = arith.constant 8 : i32
    %410 = arith.muli %c0_i32_237, %c8_i32_244 : i32
    %c1_i32_245 = arith.constant 1 : i32
    %411 = arith.addi %410, %c1_i32_245 : i32
    %412 = arith.addi %0, %411 : i32
    %c4_i32_246 = arith.constant 4 : i32
    %413 = arith.muli %412, %c4_i32_246 : i32
    %c0_i32_247 = arith.constant 0 : i32
    %414 = arith.addi %413, %c0_i32_247 : i32
    %415 = arith.index_cast %414 : i32 to index
    %416 = memref.load %arg2[%415] : memref<32xi32, #tpu.memory_space<smem>>
    %417 = arith.index_cast %416 : i32 to index
    %c0_248 = arith.constant 0 : index
    %418 = vector.load %arg5[%417, %c0_248] : memref<256x128xf32, #tpu.memory_space<vmem>>, vector<1x128xf32>
    %419 = arith.index_cast %411 : i32 to index
    %c0_249 = arith.constant 0 : index
    %420 = vector.load %arg9[%419, %c0_249] : memref<8x128xf32, #tpu.memory_space<vmem>>, vector<1x128xf32>
    tpu.vector_store %arg9[%419, %c0_249], %418 {strides = array<i32>} : memref<8x128xf32, #tpu.memory_space<vmem>>, vector<1x128xf32>,
    %c8_i32_250 = arith.constant 8 : i32
    %421 = arith.muli %c0_i32_237, %c8_i32_250 : i32
    %c2_i32_251 = arith.constant 2 : i32
    %422 = arith.addi %421, %c2_i32_251 : i32
    %423 = arith.addi %0, %422 : i32
    %c4_i32_252 = arith.constant 4 : i32
    %424 = arith.muli %423, %c4_i32_252 : i32
    %c0_i32_253 = arith.constant 0 : i32
    %425 = arith.addi %424, %c0_i32_253 : i32
    %426 = arith.index_cast %425 : i32 to index
    %427 = memref.load %arg2[%426] : memref<32xi32, #tpu.memory_space<smem>>
    %428 = arith.index_cast %427 : i32 to index
    %c0_254 = arith.constant 0 : index
    %429 = vector.load %arg5[%428, %c0_254] : memref<256x128xf32, #tpu.memory_space<vmem>>, vector<1x128xf32>
    %430 = arith.index_cast %422 : i32 to index
    %c0_255 = arith.constant 0 : index
    %431 = vector.load %arg9[%430, %c0_255] : memref<8x128xf32, #tpu.memory_space<vmem>>, vector<1x128xf32>
    tpu.vector_store %arg9[%430, %c0_255], %429 {strides = array<i32>} : memref<8x128xf32, #tpu.memory_space<vmem>>, vector<1x128xf32>,
    %c8_i32_256 = arith.constant 8 : i32
    %432 = arith.muli %c0_i32_237, %c8_i32_256 : i32
    %c3_i32_257 = arith.constant 3 : i32
    %433 = arith.addi %432, %c3_i32_257 : i32
    %434 = arith.addi %0, %433 : i32
    %c4_i32_258 = arith.constant 4 : i32
    %435 = arith.muli %434, %c4_i32_258 : i32
    %c0_i32_259 = arith.constant 0 : i32
    %436 = arith.addi %435, %c0_i32_259 : i32
    %437 = arith.index_cast %436 : i32 to index
    %438 = memref.load %arg2[%437] : memref<32xi32, #tpu.memory_space<smem>>
    %439 = arith.index_cast %438 : i32 to index
    %c0_260 = arith.constant 0 : index
    %440 = vector.load %arg5[%439, %c0_260] : memref<256x128xf32, #tpu.memory_space<vmem>>, vector<1x128xf32>
    %441 = arith.index_cast %433 : i32 to index
    %c0_261 = arith.constant 0 : index
    %442 = vector.load %arg9[%441, %c0_261] : memref<8x128xf32, #tpu.memory_space<vmem>>, vector<1x128xf32>
    tpu.vector_store %arg9[%441, %c0_261], %440 {strides = array<i32>} : memref<8x128xf32, #tpu.memory_space<vmem>>, vector<1x128xf32>,
    %c8_i32_262 = arith.constant 8 : i32
    %443 = arith.muli %c0_i32_237, %c8_i32_262 : i32
    %c4_i32_263 = arith.constant 4 : i32
    %444 = arith.addi %443, %c4_i32_263 : i32
    %445 = arith.addi %0, %444 : i32
    %c4_i32_264 = arith.constant 4 : i32
    %446 = arith.muli %445, %c4_i32_264 : i32
    %c0_i32_265 = arith.constant 0 : i32
    %447 = arith.addi %446, %c0_i32_265 : i32
    %448 = arith.index_cast %447 : i32 to index
    %449 = memref.load %arg2[%448] : memref<32xi32, #tpu.memory_space<smem>>
    %450 = arith.index_cast %449 : i32 to index
    %c0_266 = arith.constant 0 : index
    %451 = vector.load %arg5[%450, %c0_266] : memref<256x128xf32, #tpu.memory_space<vmem>>, vector<1x128xf32>
    %452 = arith.index_cast %444 : i32 to index
    %c0_267 = arith.constant 0 : index
    %453 = vector.load %arg9[%452, %c0_267] : memref<8x128xf32, #tpu.memory_space<vmem>>, vector<1x128xf32>
    tpu.vector_store %arg9[%452, %c0_267], %451 {strides = array<i32>} : memref<8x128xf32, #tpu.memory_space<vmem>>, vector<1x128xf32>,
    %c8_i32_268 = arith.constant 8 : i32
    %454 = arith.muli %c0_i32_237, %c8_i32_268 : i32
    %c5_i32_269 = arith.constant 5 : i32
    %455 = arith.addi %454, %c5_i32_269 : i32
    %456 = arith.addi %0, %455 : i32
    %c4_i32_270 = arith.constant 4 : i32
    %457 = arith.muli %456, %c4_i32_270 : i32
    %c0_i32_271 = arith.constant 0 : i32
    %458 = arith.addi %457, %c0_i32_271 : i32
    %459 = arith.index_cast %458 : i32 to index
    %460 = memref.load %arg2[%459] : memref<32xi32, #tpu.memory_space<smem>>
    %461 = arith.index_cast %460 : i32 to index
    %c0_272 = arith.constant 0 : index
    %462 = vector.load %arg5[%461, %c0_272] : memref<256x128xf32, #tpu.memory_space<vmem>>, vector<1x128xf32>
    %463 = arith.index_cast %455 : i32 to index
    %c0_273 = arith.constant 0 : index
    %464 = vector.load %arg9[%463, %c0_273] : memref<8x128xf32, #tpu.memory_space<vmem>>, vector<1x128xf32>
    tpu.vector_store %arg9[%463, %c0_273], %462 {strides = array<i32>} : memref<8x128xf32, #tpu.memory_space<vmem>>, vector<1x128xf32>,
    %c8_i32_274 = arith.constant 8 : i32
    %465 = arith.muli %c0_i32_237, %c8_i32_274 : i32
    %c6_i32_275 = arith.constant 6 : i32
    %466 = arith.addi %465, %c6_i32_275 : i32
    %467 = arith.addi %0, %466 : i32
    %c4_i32_276 = arith.constant 4 : i32
    %468 = arith.muli %467, %c4_i32_276 : i32
    %c0_i32_277 = arith.constant 0 : i32
    %469 = arith.addi %468, %c0_i32_277 : i32
    %470 = arith.index_cast %469 : i32 to index
    %471 = memref.load %arg2[%470] : memref<32xi32, #tpu.memory_space<smem>>
    %472 = arith.index_cast %471 : i32 to index
    %c0_278 = arith.constant 0 : index
    %473 = vector.load %arg5[%472, %c0_278] : memref<256x128xf32, #tpu.memory_space<vmem>>, vector<1x128xf32>
    %474 = arith.index_cast %466 : i32 to index
    %c0_279 = arith.constant 0 : index
    %475 = vector.load %arg9[%474, %c0_279] : memref<8x128xf32, #tpu.memory_space<vmem>>, vector<1x128xf32>
    tpu.vector_store %arg9[%474, %c0_279], %473 {strides = array<i32>} : memref<8x128xf32, #tpu.memory_space<vmem>>, vector<1x128xf32>,
    %c8_i32_280 = arith.constant 8 : i32
    %476 = arith.muli %c0_i32_237, %c8_i32_280 : i32
    %c7_i32_281 = arith.constant 7 : i32
    %477 = arith.addi %476, %c7_i32_281 : i32
    %478 = arith.addi %0, %477 : i32
    %c4_i32_282 = arith.constant 4 : i32
    %479 = arith.muli %478, %c4_i32_282 : i32
    %c0_i32_283 = arith.constant 0 : i32
    %480 = arith.addi %479, %c0_i32_283 : i32
    %481 = arith.index_cast %480 : i32 to index
    %482 = memref.load %arg2[%481] : memref<32xi32, #tpu.memory_space<smem>>
    %483 = arith.index_cast %482 : i32 to index
    %c0_284 = arith.constant 0 : index
    %484 = vector.load %arg5[%483, %c0_284] : memref<256x128xf32, #tpu.memory_space<vmem>>, vector<1x128xf32>
    %485 = arith.index_cast %477 : i32 to index
    %c0_285 = arith.constant 0 : index
    %486 = vector.load %arg9[%485, %c0_285] : memref<8x128xf32, #tpu.memory_space<vmem>>, vector<1x128xf32>
    tpu.vector_store %arg9[%485, %c0_285], %484 {strides = array<i32>} : memref<8x128xf32, #tpu.memory_space<vmem>>, vector<1x128xf32>,
    %c1_i32_286 = arith.constant 1 : i32
    %c0_287 = arith.constant 0 : index
    %c0_288 = arith.constant 0 : index
    %487 = vector.load %arg9[%c0_287, %c0_288] : memref<8x128xf32, #tpu.memory_space<vmem>>, vector<8x128xf32>
    %cst_289 = arith.constant 0.000000e+00 : f32
    %488 = vector.broadcast %cst_289 : f32 to vector<8x128xf32>
    %489 = arith.cmpf one, %487, %488 : vector<8x128xf32>
    %490 = arith.extui %489 : vector<8x128xi1> to vector<8x128xi32>
    %491 = arith.sitofp %490 : vector<8x128xi32> to vector<8x128xf32>
    %c0_290 = arith.constant 0 : index
    %c0_291 = arith.constant 0 : index
    %492 = vector.load %arg10[%c0_290, %c0_291] : memref<8x128xf32, #tpu.memory_space<vmem>>, vector<8x128xf32>
    tpu.vector_store %arg10[%c0_290, %c0_291], %487 {strides = array<i32>} : memref<8x128xf32, #tpu.memory_space<vmem>>, vector<8x128xf32>,
    %c0_292 = arith.constant 0 : index
    %c0_293 = arith.constant 0 : index
    %493 = vector.load %arg11[%c0_292, %c0_293] : memref<8x128xf32, #tpu.memory_space<vmem>>, vector<8x128xf32>
    tpu.vector_store %arg11[%c0_292, %c0_293], %491 {strides = array<i32>} : memref<8x128xf32, #tpu.memory_space<vmem>>, vector<8x128xf32>,
    %c0_i32_294 = arith.constant 0 : i32
    %c8_i32_295 = arith.constant 8 : i32
    %494 = arith.muli %c0_i32_294, %c8_i32_295 : i32
    %c0_i32_296 = arith.constant 0 : i32
    %495 = arith.addi %494, %c0_i32_296 : i32
    %496 = arith.addi %0, %495 : i32
    %c4_i32_297 = arith.constant 4 : i32
    %497 = arith.muli %496, %c4_i32_297 : i32
    %c1_i32_298 = arith.constant 1 : i32
    %498 = arith.addi %497, %c1_i32_298 : i32
    %499 = arith.index_cast %498 : i32 to index
    %500 = memref.load %arg2[%499] : memref<32xi32, #tpu.memory_space<smem>>
    %501 = arith.index_cast %500 : i32 to index
    %c0_299 = arith.constant 0 : index
    %502 = vector.load %arg5[%501, %c0_299] : memref<256x128xf32, #tpu.memory_space<vmem>>, vector<1x128xf32>
    %503 = arith.index_cast %495 : i32 to index
    %c0_300 = arith.constant 0 : index
    %504 = vector.load %arg9[%503, %c0_300] : memref<8x128xf32, #tpu.memory_space<vmem>>, vector<1x128xf32>
    tpu.vector_store %arg9[%503, %c0_300], %502 {strides = array<i32>} : memref<8x128xf32, #tpu.memory_space<vmem>>, vector<1x128xf32>,
    %c8_i32_301 = arith.constant 8 : i32
    %505 = arith.muli %c0_i32_294, %c8_i32_301 : i32
    %c1_i32_302 = arith.constant 1 : i32
    %506 = arith.addi %505, %c1_i32_302 : i32
    %507 = arith.addi %0, %506 : i32
    %c4_i32_303 = arith.constant 4 : i32
    %508 = arith.muli %507, %c4_i32_303 : i32
    %c1_i32_304 = arith.constant 1 : i32
    %509 = arith.addi %508, %c1_i32_304 : i32
    %510 = arith.index_cast %509 : i32 to index
    %511 = memref.load %arg2[%510] : memref<32xi32, #tpu.memory_space<smem>>
    %512 = arith.index_cast %511 : i32 to index
    %c0_305 = arith.constant 0 : index
    %513 = vector.load %arg5[%512, %c0_305] : memref<256x128xf32, #tpu.memory_space<vmem>>, vector<1x128xf32>
    %514 = arith.index_cast %506 : i32 to index
    %c0_306 = arith.constant 0 : index
    %515 = vector.load %arg9[%514, %c0_306] : memref<8x128xf32, #tpu.memory_space<vmem>>, vector<1x128xf32>
    tpu.vector_store %arg9[%514, %c0_306], %513 {strides = array<i32>} : memref<8x128xf32, #tpu.memory_space<vmem>>, vector<1x128xf32>,
    %c8_i32_307 = arith.constant 8 : i32
    %516 = arith.muli %c0_i32_294, %c8_i32_307 : i32
    %c2_i32_308 = arith.constant 2 : i32
    %517 = arith.addi %516, %c2_i32_308 : i32
    %518 = arith.addi %0, %517 : i32
    %c4_i32_309 = arith.constant 4 : i32
    %519 = arith.muli %518, %c4_i32_309 : i32
    %c1_i32_310 = arith.constant 1 : i32
    %520 = arith.addi %519, %c1_i32_310 : i32
    %521 = arith.index_cast %520 : i32 to index
    %522 = memref.load %arg2[%521] : memref<32xi32, #tpu.memory_space<smem>>
    %523 = arith.index_cast %522 : i32 to index
    %c0_311 = arith.constant 0 : index
    %524 = vector.load %arg5[%523, %c0_311] : memref<256x128xf32, #tpu.memory_space<vmem>>, vector<1x128xf32>
    %525 = arith.index_cast %517 : i32 to index
    %c0_312 = arith.constant 0 : index
    %526 = vector.load %arg9[%525, %c0_312] : memref<8x128xf32, #tpu.memory_space<vmem>>, vector<1x128xf32>
    tpu.vector_store %arg9[%525, %c0_312], %524 {strides = array<i32>} : memref<8x128xf32, #tpu.memory_space<vmem>>, vector<1x128xf32>,
    %c8_i32_313 = arith.constant 8 : i32
    %527 = arith.muli %c0_i32_294, %c8_i32_313 : i32
    %c3_i32_314 = arith.constant 3 : i32
    %528 = arith.addi %527, %c3_i32_314 : i32
    %529 = arith.addi %0, %528 : i32
    %c4_i32_315 = arith.constant 4 : i32
    %530 = arith.muli %529, %c4_i32_315 : i32
    %c1_i32_316 = arith.constant 1 : i32
    %531 = arith.addi %530, %c1_i32_316 : i32
    %532 = arith.index_cast %531 : i32 to index
    %533 = memref.load %arg2[%532] : memref<32xi32, #tpu.memory_space<smem>>
    %534 = arith.index_cast %533 : i32 to index
    %c0_317 = arith.constant 0 : index
    %535 = vector.load %arg5[%534, %c0_317] : memref<256x128xf32, #tpu.memory_space<vmem>>, vector<1x128xf32>
    %536 = arith.index_cast %528 : i32 to index
    %c0_318 = arith.constant 0 : index
    %537 = vector.load %arg9[%536, %c0_318] : memref<8x128xf32, #tpu.memory_space<vmem>>, vector<1x128xf32>
    tpu.vector_store %arg9[%536, %c0_318], %535 {strides = array<i32>} : memref<8x128xf32, #tpu.memory_space<vmem>>, vector<1x128xf32>,
    %c8_i32_319 = arith.constant 8 : i32
    %538 = arith.muli %c0_i32_294, %c8_i32_319 : i32
    %c4_i32_320 = arith.constant 4 : i32
    %539 = arith.addi %538, %c4_i32_320 : i32
    %540 = arith.addi %0, %539 : i32
    %c4_i32_321 = arith.constant 4 : i32
    %541 = arith.muli %540, %c4_i32_321 : i32
    %c1_i32_322 = arith.constant 1 : i32
    %542 = arith.addi %541, %c1_i32_322 : i32
    %543 = arith.index_cast %542 : i32 to index
    %544 = memref.load %arg2[%543] : memref<32xi32, #tpu.memory_space<smem>>
    %545 = arith.index_cast %544 : i32 to index
    %c0_323 = arith.constant 0 : index
    %546 = vector.load %arg5[%545, %c0_323] : memref<256x128xf32, #tpu.memory_space<vmem>>, vector<1x128xf32>
    %547 = arith.index_cast %539 : i32 to index
    %c0_324 = arith.constant 0 : index
    %548 = vector.load %arg9[%547, %c0_324] : memref<8x128xf32, #tpu.memory_space<vmem>>, vector<1x128xf32>
    tpu.vector_store %arg9[%547, %c0_324], %546 {strides = array<i32>} : memref<8x128xf32, #tpu.memory_space<vmem>>, vector<1x128xf32>,
    %c8_i32_325 = arith.constant 8 : i32
    %549 = arith.muli %c0_i32_294, %c8_i32_325 : i32
    %c5_i32_326 = arith.constant 5 : i32
    %550 = arith.addi %549, %c5_i32_326 : i32
    %551 = arith.addi %0, %550 : i32
    %c4_i32_327 = arith.constant 4 : i32
    %552 = arith.muli %551, %c4_i32_327 : i32
    %c1_i32_328 = arith.constant 1 : i32
    %553 = arith.addi %552, %c1_i32_328 : i32
    %554 = arith.index_cast %553 : i32 to index
    %555 = memref.load %arg2[%554] : memref<32xi32, #tpu.memory_space<smem>>
    %556 = arith.index_cast %555 : i32 to index
    %c0_329 = arith.constant 0 : index
    %557 = vector.load %arg5[%556, %c0_329] : memref<256x128xf32, #tpu.memory_space<vmem>>, vector<1x128xf32>
    %558 = arith.index_cast %550 : i32 to index
    %c0_330 = arith.constant 0 : index
    %559 = vector.load %arg9[%558, %c0_330] : memref<8x128xf32, #tpu.memory_space<vmem>>, vector<1x128xf32>
    tpu.vector_store %arg9[%558, %c0_330], %557 {strides = array<i32>} : memref<8x128xf32, #tpu.memory_space<vmem>>, vector<1x128xf32>,
    %c8_i32_331 = arith.constant 8 : i32
    %560 = arith.muli %c0_i32_294, %c8_i32_331 : i32
    %c6_i32_332 = arith.constant 6 : i32
    %561 = arith.addi %560, %c6_i32_332 : i32
    %562 = arith.addi %0, %561 : i32
    %c4_i32_333 = arith.constant 4 : i32
    %563 = arith.muli %562, %c4_i32_333 : i32
    %c1_i32_334 = arith.constant 1 : i32
    %564 = arith.addi %563, %c1_i32_334 : i32
    %565 = arith.index_cast %564 : i32 to index
    %566 = memref.load %arg2[%565] : memref<32xi32, #tpu.memory_space<smem>>
    %567 = arith.index_cast %566 : i32 to index
    %c0_335 = arith.constant 0 : index
    %568 = vector.load %arg5[%567, %c0_335] : memref<256x128xf32, #tpu.memory_space<vmem>>, vector<1x128xf32>
    %569 = arith.index_cast %561 : i32 to index
    %c0_336 = arith.constant 0 : index
    %570 = vector.load %arg9[%569, %c0_336] : memref<8x128xf32, #tpu.memory_space<vmem>>, vector<1x128xf32>
    tpu.vector_store %arg9[%569, %c0_336], %568 {strides = array<i32>} : memref<8x128xf32, #tpu.memory_space<vmem>>, vector<1x128xf32>,
    %c8_i32_337 = arith.constant 8 : i32
    %571 = arith.muli %c0_i32_294, %c8_i32_337 : i32
    %c7_i32_338 = arith.constant 7 : i32
    %572 = arith.addi %571, %c7_i32_338 : i32
    %573 = arith.addi %0, %572 : i32
    %c4_i32_339 = arith.constant 4 : i32
    %574 = arith.muli %573, %c4_i32_339 : i32
    %c1_i32_340 = arith.constant 1 : i32
    %575 = arith.addi %574, %c1_i32_340 : i32
    %576 = arith.index_cast %575 : i32 to index
    %577 = memref.load %arg2[%576] : memref<32xi32, #tpu.memory_space<smem>>
    %578 = arith.index_cast %577 : i32 to index
    %c0_341 = arith.constant 0 : index
    %579 = vector.load %arg5[%578, %c0_341] : memref<256x128xf32, #tpu.memory_space<vmem>>, vector<1x128xf32>
    %580 = arith.index_cast %572 : i32 to index
    %c0_342 = arith.constant 0 : index
    %581 = vector.load %arg9[%580, %c0_342] : memref<8x128xf32, #tpu.memory_space<vmem>>, vector<1x128xf32>
    tpu.vector_store %arg9[%580, %c0_342], %579 {strides = array<i32>} : memref<8x128xf32, #tpu.memory_space<vmem>>, vector<1x128xf32>,
    %c1_i32_343 = arith.constant 1 : i32
    %c0_344 = arith.constant 0 : index
    %c0_345 = arith.constant 0 : index
    %582 = vector.load %arg9[%c0_344, %c0_345] : memref<8x128xf32, #tpu.memory_space<vmem>>, vector<8x128xf32>
    %cst_346 = arith.constant 0.000000e+00 : f32
    %583 = vector.broadcast %cst_346 : f32 to vector<8x128xf32>
    %584 = arith.cmpf one, %582, %583 : vector<8x128xf32>
    %585 = arith.extui %584 : vector<8x128xi1> to vector<8x128xi32>
    %586 = arith.sitofp %585 : vector<8x128xi32> to vector<8x128xf32>
    %c0_347 = arith.constant 0 : index
    %c0_348 = arith.constant 0 : index
    %587 = vector.load %arg10[%c0_347, %c0_348] : memref<8x128xf32, #tpu.memory_space<vmem>>, vector<8x128xf32>
    %588 = arith.addf %587, %582 : vector<8x128xf32>
    %c0_349 = arith.constant 0 : index
    %c0_350 = arith.constant 0 : index
    %589 = vector.load %arg10[%c0_349, %c0_350] : memref<8x128xf32, #tpu.memory_space<vmem>>, vector<8x128xf32>
    tpu.vector_store %arg10[%c0_349, %c0_350], %588 {strides = array<i32>} : memref<8x128xf32, #tpu.memory_space<vmem>>, vector<8x128xf32>,
    %c0_351 = arith.constant 0 : index
    %c0_352 = arith.constant 0 : index
    %590 = vector.load %arg11[%c0_351, %c0_352] : memref<8x128xf32, #tpu.memory_space<vmem>>, vector<8x128xf32>
    %591 = arith.addf %590, %586 : vector<8x128xf32>
    %c0_353 = arith.constant 0 : index
    %c0_354 = arith.constant 0 : index
    %592 = vector.load %arg11[%c0_353, %c0_354] : memref<8x128xf32, #tpu.memory_space<vmem>>, vector<8x128xf32>
    tpu.vector_store %arg11[%c0_353, %c0_354], %591 {strides = array<i32>} : memref<8x128xf32, #tpu.memory_space<vmem>>, vector<8x128xf32>,
    %c0_i32_355 = arith.constant 0 : i32
    %c8_i32_356 = arith.constant 8 : i32
    %593 = arith.muli %c0_i32_355, %c8_i32_356 : i32
    %c0_i32_357 = arith.constant 0 : i32
    %594 = arith.addi %593, %c0_i32_357 : i32
    %595 = arith.addi %0, %594 : i32
    %c4_i32_358 = arith.constant 4 : i32
    %596 = arith.muli %595, %c4_i32_358 : i32
    %c2_i32_359 = arith.constant 2 : i32
    %597 = arith.addi %596, %c2_i32_359 : i32
    %598 = arith.index_cast %597 : i32 to index
    %599 = memref.load %arg2[%598] : memref<32xi32, #tpu.memory_space<smem>>
    %600 = arith.index_cast %599 : i32 to index
    %c0_360 = arith.constant 0 : index
    %601 = vector.load %arg5[%600, %c0_360] : memref<256x128xf32, #tpu.memory_space<vmem>>, vector<1x128xf32>
    %602 = arith.index_cast %594 : i32 to index
    %c0_361 = arith.constant 0 : index
    %603 = vector.load %arg9[%602, %c0_361] : memref<8x128xf32, #tpu.memory_space<vmem>>, vector<1x128xf32>
    tpu.vector_store %arg9[%602, %c0_361], %601 {strides = array<i32>} : memref<8x128xf32, #tpu.memory_space<vmem>>, vector<1x128xf32>,
    %c8_i32_362 = arith.constant 8 : i32
    %604 = arith.muli %c0_i32_355, %c8_i32_362 : i32
    %c1_i32_363 = arith.constant 1 : i32
    %605 = arith.addi %604, %c1_i32_363 : i32
    %606 = arith.addi %0, %605 : i32
    %c4_i32_364 = arith.constant 4 : i32
    %607 = arith.muli %606, %c4_i32_364 : i32
    %c2_i32_365 = arith.constant 2 : i32
    %608 = arith.addi %607, %c2_i32_365 : i32
    %609 = arith.index_cast %608 : i32 to index
    %610 = memref.load %arg2[%609] : memref<32xi32, #tpu.memory_space<smem>>
    %611 = arith.index_cast %610 : i32 to index
    %c0_366 = arith.constant 0 : index
    %612 = vector.load %arg5[%611, %c0_366] : memref<256x128xf32, #tpu.memory_space<vmem>>, vector<1x128xf32>
    %613 = arith.index_cast %605 : i32 to index
    %c0_367 = arith.constant 0 : index
    %614 = vector.load %arg9[%613, %c0_367] : memref<8x128xf32, #tpu.memory_space<vmem>>, vector<1x128xf32>
    tpu.vector_store %arg9[%613, %c0_367], %612 {strides = array<i32>} : memref<8x128xf32, #tpu.memory_space<vmem>>, vector<1x128xf32>,
    %c8_i32_368 = arith.constant 8 : i32
    %615 = arith.muli %c0_i32_355, %c8_i32_368 : i32
    %c2_i32_369 = arith.constant 2 : i32
    %616 = arith.addi %615, %c2_i32_369 : i32
    %617 = arith.addi %0, %616 : i32
    %c4_i32_370 = arith.constant 4 : i32
    %618 = arith.muli %617, %c4_i32_370 : i32
    %c2_i32_371 = arith.constant 2 : i32
    %619 = arith.addi %618, %c2_i32_371 : i32
    %620 = arith.index_cast %619 : i32 to index
    %621 = memref.load %arg2[%620] : memref<32xi32, #tpu.memory_space<smem>>
    %622 = arith.index_cast %621 : i32 to index
    %c0_372 = arith.constant 0 : index
    %623 = vector.load %arg5[%622, %c0_372] : memref<256x128xf32, #tpu.memory_space<vmem>>, vector<1x128xf32>
    %624 = arith.index_cast %616 : i32 to index
    %c0_373 = arith.constant 0 : index
    %625 = vector.load %arg9[%624, %c0_373] : memref<8x128xf32, #tpu.memory_space<vmem>>, vector<1x128xf32>
    tpu.vector_store %arg9[%624, %c0_373], %623 {strides = array<i32>} : memref<8x128xf32, #tpu.memory_space<vmem>>, vector<1x128xf32>,
    %c8_i32_374 = arith.constant 8 : i32
    %626 = arith.muli %c0_i32_355, %c8_i32_374 : i32
    %c3_i32_375 = arith.constant 3 : i32
    %627 = arith.addi %626, %c3_i32_375 : i32
    %628 = arith.addi %0, %627 : i32
    %c4_i32_376 = arith.constant 4 : i32
    %629 = arith.muli %628, %c4_i32_376 : i32
    %c2_i32_377 = arith.constant 2 : i32
    %630 = arith.addi %629, %c2_i32_377 : i32
    %631 = arith.index_cast %630 : i32 to index
    %632 = memref.load %arg2[%631] : memref<32xi32, #tpu.memory_space<smem>>
    %633 = arith.index_cast %632 : i32 to index
    %c0_378 = arith.constant 0 : index
    %634 = vector.load %arg5[%633, %c0_378] : memref<256x128xf32, #tpu.memory_space<vmem>>, vector<1x128xf32>
    %635 = arith.index_cast %627 : i32 to index
    %c0_379 = arith.constant 0 : index
    %636 = vector.load %arg9[%635, %c0_379] : memref<8x128xf32, #tpu.memory_space<vmem>>, vector<1x128xf32>
    tpu.vector_store %arg9[%635, %c0_379], %634 {strides = array<i32>} : memref<8x128xf32, #tpu.memory_space<vmem>>, vector<1x128xf32>,
    %c8_i32_380 = arith.constant 8 : i32
    %637 = arith.muli %c0_i32_355, %c8_i32_380 : i32
    %c4_i32_381 = arith.constant 4 : i32
    %638 = arith.addi %637, %c4_i32_381 : i32
    %639 = arith.addi %0, %638 : i32
    %c4_i32_382 = arith.constant 4 : i32
    %640 = arith.muli %639, %c4_i32_382 : i32
    %c2_i32_383 = arith.constant 2 : i32
    %641 = arith.addi %640, %c2_i32_383 : i32
    %642 = arith.index_cast %641 : i32 to index
    %643 = memref.load %arg2[%642] : memref<32xi32, #tpu.memory_space<smem>>
    %644 = arith.index_cast %643 : i32 to index
    %c0_384 = arith.constant 0 : index
    %645 = vector.load %arg5[%644, %c0_384] : memref<256x128xf32, #tpu.memory_space<vmem>>, vector<1x128xf32>
    %646 = arith.index_cast %638 : i32 to index
    %c0_385 = arith.constant 0 : index
    %647 = vector.load %arg9[%646, %c0_385] : memref<8x128xf32, #tpu.memory_space<vmem>>, vector<1x128xf32>
    tpu.vector_store %arg9[%646, %c0_385], %645 {strides = array<i32>} : memref<8x128xf32, #tpu.memory_space<vmem>>, vector<1x128xf32>,
    %c8_i32_386 = arith.constant 8 : i32
    %648 = arith.muli %c0_i32_355, %c8_i32_386 : i32
    %c5_i32_387 = arith.constant 5 : i32
    %649 = arith.addi %648, %c5_i32_387 : i32
    %650 = arith.addi %0, %649 : i32
    %c4_i32_388 = arith.constant 4 : i32
    %651 = arith.muli %650, %c4_i32_388 : i32
    %c2_i32_389 = arith.constant 2 : i32
    %652 = arith.addi %651, %c2_i32_389 : i32
    %653 = arith.index_cast %652 : i32 to index
    %654 = memref.load %arg2[%653] : memref<32xi32, #tpu.memory_space<smem>>
    %655 = arith.index_cast %654 : i32 to index
    %c0_390 = arith.constant 0 : index
    %656 = vector.load %arg5[%655, %c0_390] : memref<256x128xf32, #tpu.memory_space<vmem>>, vector<1x128xf32>
    %657 = arith.index_cast %649 : i32 to index
    %c0_391 = arith.constant 0 : index
    %658 = vector.load %arg9[%657, %c0_391] : memref<8x128xf32, #tpu.memory_space<vmem>>, vector<1x128xf32>
    tpu.vector_store %arg9[%657, %c0_391], %656 {strides = array<i32>} : memref<8x128xf32, #tpu.memory_space<vmem>>, vector<1x128xf32>,
    %c8_i32_392 = arith.constant 8 : i32
    %659 = arith.muli %c0_i32_355, %c8_i32_392 : i32
    %c6_i32_393 = arith.constant 6 : i32
    %660 = arith.addi %659, %c6_i32_393 : i32
    %661 = arith.addi %0, %660 : i32
    %c4_i32_394 = arith.constant 4 : i32
    %662 = arith.muli %661, %c4_i32_394 : i32
    %c2_i32_395 = arith.constant 2 : i32
    %663 = arith.addi %662, %c2_i32_395 : i32
    %664 = arith.index_cast %663 : i32 to index
    %665 = memref.load %arg2[%664] : memref<32xi32, #tpu.memory_space<smem>>
    %666 = arith.index_cast %665 : i32 to index
    %c0_396 = arith.constant 0 : index
    %667 = vector.load %arg5[%666, %c0_396] : memref<256x128xf32, #tpu.memory_space<vmem>>, vector<1x128xf32>
    %668 = arith.index_cast %660 : i32 to index
    %c0_397 = arith.constant 0 : index
    %669 = vector.load %arg9[%668, %c0_397] : memref<8x128xf32, #tpu.memory_space<vmem>>, vector<1x128xf32>
    tpu.vector_store %arg9[%668, %c0_397], %667 {strides = array<i32>} : memref<8x128xf32, #tpu.memory_space<vmem>>, vector<1x128xf32>,
    %c8_i32_398 = arith.constant 8 : i32
    %670 = arith.muli %c0_i32_355, %c8_i32_398 : i32
    %c7_i32_399 = arith.constant 7 : i32
    %671 = arith.addi %670, %c7_i32_399 : i32
    %672 = arith.addi %0, %671 : i32
    %c4_i32_400 = arith.constant 4 : i32
    %673 = arith.muli %672, %c4_i32_400 : i32
    %c2_i32_401 = arith.constant 2 : i32
    %674 = arith.addi %673, %c2_i32_401 : i32
    %675 = arith.index_cast %674 : i32 to index
    %676 = memref.load %arg2[%675] : memref<32xi32, #tpu.memory_space<smem>>
    %677 = arith.index_cast %676 : i32 to index
    %c0_402 = arith.constant 0 : index
    %678 = vector.load %arg5[%677, %c0_402] : memref<256x128xf32, #tpu.memory_space<vmem>>, vector<1x128xf32>
    %679 = arith.index_cast %671 : i32 to index
    %c0_403 = arith.constant 0 : index
    %680 = vector.load %arg9[%679, %c0_403] : memref<8x128xf32, #tpu.memory_space<vmem>>, vector<1x128xf32>
    tpu.vector_store %arg9[%679, %c0_403], %678 {strides = array<i32>} : memref<8x128xf32, #tpu.memory_space<vmem>>, vector<1x128xf32>,
    %c1_i32_404 = arith.constant 1 : i32
    %c0_405 = arith.constant 0 : index
    %c0_406 = arith.constant 0 : index
    %681 = vector.load %arg9[%c0_405, %c0_406] : memref<8x128xf32, #tpu.memory_space<vmem>>, vector<8x128xf32>
    %cst_407 = arith.constant 0.000000e+00 : f32
    %682 = vector.broadcast %cst_407 : f32 to vector<8x128xf32>
    %683 = arith.cmpf one, %681, %682 : vector<8x128xf32>
    %684 = arith.extui %683 : vector<8x128xi1> to vector<8x128xi32>
    %685 = arith.sitofp %684 : vector<8x128xi32> to vector<8x128xf32>
    %c0_408 = arith.constant 0 : index
    %c0_409 = arith.constant 0 : index
    %686 = vector.load %arg10[%c0_408, %c0_409] : memref<8x128xf32, #tpu.memory_space<vmem>>, vector<8x128xf32>
    %687 = arith.addf %686, %681 : vector<8x128xf32>
    %c0_410 = arith.constant 0 : index
    %c0_411 = arith.constant 0 : index
    %688 = vector.load %arg10[%c0_410, %c0_411] : memref<8x128xf32, #tpu.memory_space<vmem>>, vector<8x128xf32>
    tpu.vector_store %arg10[%c0_410, %c0_411], %687 {strides = array<i32>} : memref<8x128xf32, #tpu.memory_space<vmem>>, vector<8x128xf32>,
    %c0_412 = arith.constant 0 : index
    %c0_413 = arith.constant 0 : index
    %689 = vector.load %arg11[%c0_412, %c0_413] : memref<8x128xf32, #tpu.memory_space<vmem>>, vector<8x128xf32>
    %690 = arith.addf %689, %685 : vector<8x128xf32>
    %c0_414 = arith.constant 0 : index
    %c0_415 = arith.constant 0 : index
    %691 = vector.load %arg11[%c0_414, %c0_415] : memref<8x128xf32, #tpu.memory_space<vmem>>, vector<8x128xf32>
    tpu.vector_store %arg11[%c0_414, %c0_415], %690 {strides = array<i32>} : memref<8x128xf32, #tpu.memory_space<vmem>>, vector<8x128xf32>,
    %c0_i32_416 = arith.constant 0 : i32
    %c8_i32_417 = arith.constant 8 : i32
    %692 = arith.muli %c0_i32_416, %c8_i32_417 : i32
    %c0_i32_418 = arith.constant 0 : i32
    %693 = arith.addi %692, %c0_i32_418 : i32
    %694 = arith.addi %0, %693 : i32
    %c4_i32_419 = arith.constant 4 : i32
    %695 = arith.muli %694, %c4_i32_419 : i32
    %c3_i32_420 = arith.constant 3 : i32
    %696 = arith.addi %695, %c3_i32_420 : i32
    %697 = arith.index_cast %696 : i32 to index
    %698 = memref.load %arg2[%697] : memref<32xi32, #tpu.memory_space<smem>>
    %699 = arith.index_cast %698 : i32 to index
    %c0_421 = arith.constant 0 : index
    %700 = vector.load %arg5[%699, %c0_421] : memref<256x128xf32, #tpu.memory_space<vmem>>, vector<1x128xf32>
    %701 = arith.index_cast %693 : i32 to index
    %c0_422 = arith.constant 0 : index
    %702 = vector.load %arg9[%701, %c0_422] : memref<8x128xf32, #tpu.memory_space<vmem>>, vector<1x128xf32>
    tpu.vector_store %arg9[%701, %c0_422], %700 {strides = array<i32>} : memref<8x128xf32, #tpu.memory_space<vmem>>, vector<1x128xf32>,
    %c8_i32_423 = arith.constant 8 : i32
    %703 = arith.muli %c0_i32_416, %c8_i32_423 : i32
    %c1_i32_424 = arith.constant 1 : i32
    %704 = arith.addi %703, %c1_i32_424 : i32
    %705 = arith.addi %0, %704 : i32
    %c4_i32_425 = arith.constant 4 : i32
    %706 = arith.muli %705, %c4_i32_425 : i32
    %c3_i32_426 = arith.constant 3 : i32
    %707 = arith.addi %706, %c3_i32_426 : i32
    %708 = arith.index_cast %707 : i32 to index
    %709 = memref.load %arg2[%708] : memref<32xi32, #tpu.memory_space<smem>>
    %710 = arith.index_cast %709 : i32 to index
    %c0_427 = arith.constant 0 : index
    %711 = vector.load %arg5[%710, %c0_427] : memref<256x128xf32, #tpu.memory_space<vmem>>, vector<1x128xf32>
    %712 = arith.index_cast %704 : i32 to index
    %c0_428 = arith.constant 0 : index
    %713 = vector.load %arg9[%712, %c0_428] : memref<8x128xf32, #tpu.memory_space<vmem>>, vector<1x128xf32>
    tpu.vector_store %arg9[%712, %c0_428], %711 {strides = array<i32>} : memref<8x128xf32, #tpu.memory_space<vmem>>, vector<1x128xf32>,
    %c8_i32_429 = arith.constant 8 : i32
    %714 = arith.muli %c0_i32_416, %c8_i32_429 : i32
    %c2_i32_430 = arith.constant 2 : i32
    %715 = arith.addi %714, %c2_i32_430 : i32
    %716 = arith.addi %0, %715 : i32
    %c4_i32_431 = arith.constant 4 : i32
    %717 = arith.muli %716, %c4_i32_431 : i32
    %c3_i32_432 = arith.constant 3 : i32
    %718 = arith.addi %717, %c3_i32_432 : i32
    %719 = arith.index_cast %718 : i32 to index
    %720 = memref.load %arg2[%719] : memref<32xi32, #tpu.memory_space<smem>>
    %721 = arith.index_cast %720 : i32 to index
    %c0_433 = arith.constant 0 : index
    %722 = vector.load %arg5[%721, %c0_433] : memref<256x128xf32, #tpu.memory_space<vmem>>, vector<1x128xf32>
    %723 = arith.index_cast %715 : i32 to index
    %c0_434 = arith.constant 0 : index
    %724 = vector.load %arg9[%723, %c0_434] : memref<8x128xf32, #tpu.memory_space<vmem>>, vector<1x128xf32>
    tpu.vector_store %arg9[%723, %c0_434], %722 {strides = array<i32>} : memref<8x128xf32, #tpu.memory_space<vmem>>, vector<1x128xf32>,
    %c8_i32_435 = arith.constant 8 : i32
    %725 = arith.muli %c0_i32_416, %c8_i32_435 : i32
    %c3_i32_436 = arith.constant 3 : i32
    %726 = arith.addi %725, %c3_i32_436 : i32
    %727 = arith.addi %0, %726 : i32
    %c4_i32_437 = arith.constant 4 : i32
    %728 = arith.muli %727, %c4_i32_437 : i32
    %c3_i32_438 = arith.constant 3 : i32
    %729 = arith.addi %728, %c3_i32_438 : i32
    %730 = arith.index_cast %729 : i32 to index
    %731 = memref.load %arg2[%730] : memref<32xi32, #tpu.memory_space<smem>>
    %732 = arith.index_cast %731 : i32 to index
    %c0_439 = arith.constant 0 : index
    %733 = vector.load %arg5[%732, %c0_439] : memref<256x128xf32, #tpu.memory_space<vmem>>, vector<1x128xf32>
    %734 = arith.index_cast %726 : i32 to index
    %c0_440 = arith.constant 0 : index
    %735 = vector.load %arg9[%734, %c0_440] : memref<8x128xf32, #tpu.memory_space<vmem>>, vector<1x128xf32>
    tpu.vector_store %arg9[%734, %c0_440], %733 {strides = array<i32>} : memref<8x128xf32, #tpu.memory_space<vmem>>, vector<1x128xf32>,
    %c8_i32_441 = arith.constant 8 : i32
    %736 = arith.muli %c0_i32_416, %c8_i32_441 : i32
    %c4_i32_442 = arith.constant 4 : i32
    %737 = arith.addi %736, %c4_i32_442 : i32
    %738 = arith.addi %0, %737 : i32
    %c4_i32_443 = arith.constant 4 : i32
    %739 = arith.muli %738, %c4_i32_443 : i32
    %c3_i32_444 = arith.constant 3 : i32
    %740 = arith.addi %739, %c3_i32_444 : i32
    %741 = arith.index_cast %740 : i32 to index
    %742 = memref.load %arg2[%741] : memref<32xi32, #tpu.memory_space<smem>>
    %743 = arith.index_cast %742 : i32 to index
    %c0_445 = arith.constant 0 : index
    %744 = vector.load %arg5[%743, %c0_445] : memref<256x128xf32, #tpu.memory_space<vmem>>, vector<1x128xf32>
    %745 = arith.index_cast %737 : i32 to index
    %c0_446 = arith.constant 0 : index
    %746 = vector.load %arg9[%745, %c0_446] : memref<8x128xf32, #tpu.memory_space<vmem>>, vector<1x128xf32>
    tpu.vector_store %arg9[%745, %c0_446], %744 {strides = array<i32>} : memref<8x128xf32, #tpu.memory_space<vmem>>, vector<1x128xf32>,
    %c8_i32_447 = arith.constant 8 : i32
    %747 = arith.muli %c0_i32_416, %c8_i32_447 : i32
    %c5_i32_448 = arith.constant 5 : i32
    %748 = arith.addi %747, %c5_i32_448 : i32
    %749 = arith.addi %0, %748 : i32
    %c4_i32_449 = arith.constant 4 : i32
    %750 = arith.muli %749, %c4_i32_449 : i32
    %c3_i32_450 = arith.constant 3 : i32
    %751 = arith.addi %750, %c3_i32_450 : i32
    %752 = arith.index_cast %751 : i32 to index
    %753 = memref.load %arg2[%752] : memref<32xi32, #tpu.memory_space<smem>>
    %754 = arith.index_cast %753 : i32 to index
    %c0_451 = arith.constant 0 : index
    %755 = vector.load %arg5[%754, %c0_451] : memref<256x128xf32, #tpu.memory_space<vmem>>, vector<1x128xf32>
    %756 = arith.index_cast %748 : i32 to index
    %c0_452 = arith.constant 0 : index
    %757 = vector.load %arg9[%756, %c0_452] : memref<8x128xf32, #tpu.memory_space<vmem>>, vector<1x128xf32>
    tpu.vector_store %arg9[%756, %c0_452], %755 {strides = array<i32>} : memref<8x128xf32, #tpu.memory_space<vmem>>, vector<1x128xf32>,
    %c8_i32_453 = arith.constant 8 : i32
    %758 = arith.muli %c0_i32_416, %c8_i32_453 : i32
    %c6_i32_454 = arith.constant 6 : i32
    %759 = arith.addi %758, %c6_i32_454 : i32
    %760 = arith.addi %0, %759 : i32
    %c4_i32_455 = arith.constant 4 : i32
    %761 = arith.muli %760, %c4_i32_455 : i32
    %c3_i32_456 = arith.constant 3 : i32
    %762 = arith.addi %761, %c3_i32_456 : i32
    %763 = arith.index_cast %762 : i32 to index
    %764 = memref.load %arg2[%763] : memref<32xi32, #tpu.memory_space<smem>>
    %765 = arith.index_cast %764 : i32 to index
    %c0_457 = arith.constant 0 : index
    %766 = vector.load %arg5[%765, %c0_457] : memref<256x128xf32, #tpu.memory_space<vmem>>, vector<1x128xf32>
    %767 = arith.index_cast %759 : i32 to index
    %c0_458 = arith.constant 0 : index
    %768 = vector.load %arg9[%767, %c0_458] : memref<8x128xf32, #tpu.memory_space<vmem>>, vector<1x128xf32>
    tpu.vector_store %arg9[%767, %c0_458], %766 {strides = array<i32>} : memref<8x128xf32, #tpu.memory_space<vmem>>, vector<1x128xf32>,
    %c8_i32_459 = arith.constant 8 : i32
    %769 = arith.muli %c0_i32_416, %c8_i32_459 : i32
    %c7_i32_460 = arith.constant 7 : i32
    %770 = arith.addi %769, %c7_i32_460 : i32
    %771 = arith.addi %0, %770 : i32
    %c4_i32_461 = arith.constant 4 : i32
    %772 = arith.muli %771, %c4_i32_461 : i32
    %c3_i32_462 = arith.constant 3 : i32
    %773 = arith.addi %772, %c3_i32_462 : i32
    %774 = arith.index_cast %773 : i32 to index
    %775 = memref.load %arg2[%774] : memref<32xi32, #tpu.memory_space<smem>>
    %776 = arith.index_cast %775 : i32 to index
    %c0_463 = arith.constant 0 : index
    %777 = vector.load %arg5[%776, %c0_463] : memref<256x128xf32, #tpu.memory_space<vmem>>, vector<1x128xf32>
    %778 = arith.index_cast %770 : i32 to index
    %c0_464 = arith.constant 0 : index
    %779 = vector.load %arg9[%778, %c0_464] : memref<8x128xf32, #tpu.memory_space<vmem>>, vector<1x128xf32>
    tpu.vector_store %arg9[%778, %c0_464], %777 {strides = array<i32>} : memref<8x128xf32, #tpu.memory_space<vmem>>, vector<1x128xf32>,
    %c1_i32_465 = arith.constant 1 : i32
    %c0_466 = arith.constant 0 : index
    %c0_467 = arith.constant 0 : index
    %780 = vector.load %arg9[%c0_466, %c0_467] : memref<8x128xf32, #tpu.memory_space<vmem>>, vector<8x128xf32>
    %cst_468 = arith.constant 0.000000e+00 : f32
    %781 = vector.broadcast %cst_468 : f32 to vector<8x128xf32>
    %782 = arith.cmpf one, %780, %781 : vector<8x128xf32>
    %783 = arith.extui %782 : vector<8x128xi1> to vector<8x128xi32>
    %784 = arith.sitofp %783 : vector<8x128xi32> to vector<8x128xf32>
    %c0_469 = arith.constant 0 : index
    %c0_470 = arith.constant 0 : index
    %785 = vector.load %arg10[%c0_469, %c0_470] : memref<8x128xf32, #tpu.memory_space<vmem>>, vector<8x128xf32>
    %786 = arith.addf %785, %780 : vector<8x128xf32>
    %c0_471 = arith.constant 0 : index
    %c0_472 = arith.constant 0 : index
    %787 = vector.load %arg10[%c0_471, %c0_472] : memref<8x128xf32, #tpu.memory_space<vmem>>, vector<8x128xf32>
    tpu.vector_store %arg10[%c0_471, %c0_472], %786 {strides = array<i32>} : memref<8x128xf32, #tpu.memory_space<vmem>>, vector<8x128xf32>,
    %c0_473 = arith.constant 0 : index
    %c0_474 = arith.constant 0 : index
    %788 = vector.load %arg11[%c0_473, %c0_474] : memref<8x128xf32, #tpu.memory_space<vmem>>, vector<8x128xf32>
    %789 = arith.addf %788, %784 : vector<8x128xf32>
    %c0_475 = arith.constant 0 : index
    %c0_476 = arith.constant 0 : index
    %790 = vector.load %arg11[%c0_475, %c0_476] : memref<8x128xf32, #tpu.memory_space<vmem>>, vector<8x128xf32>
    tpu.vector_store %arg11[%c0_475, %c0_476], %789 {strides = array<i32>} : memref<8x128xf32, #tpu.memory_space<vmem>>, vector<8x128xf32>,
    %c0_477 = arith.constant 0 : index
    %c0_478 = arith.constant 0 : index
    %791 = vector.load %arg10[%c0_477, %c0_478] : memref<8x128xf32, #tpu.memory_space<vmem>>, vector<8x128xf32>
    %c0_479 = arith.constant 0 : index
    %c0_480 = arith.constant 0 : index
    %792 = vector.load %arg11[%c0_479, %c0_480] : memref<8x128xf32, #tpu.memory_space<vmem>>, vector<8x128xf32>
    %cst_481 = arith.constant 1.000000e+00 : f32
    %793 = vector.broadcast %cst_481 : f32 to vector<8x128xf32>
    %794 = arith.maximumf %792, %793 : vector<8x128xf32>
    %795 = arith.divf %791, %794 : vector<8x128xf32>
    %c0_482 = arith.constant 0 : index
    %c0_483 = arith.constant 0 : index
    %796 = vector.load %arg7[%c0_482, %c0_483] : memref<8x128xf32, #tpu.memory_space<vmem>>, vector<8x128xf32>
    tpu.vector_store %arg7[%c0_482, %c0_483], %795 {strides = array<i32>} : memref<8x128xf32, #tpu.memory_space<vmem>>, vector<8x128xf32>,
    %c0_i32_484 = arith.constant 0 : i32
    %c8_i32_485 = arith.constant 8 : i32
    %797 = arith.addi %c0_i32_484, %c8_i32_485 : i32
    %c1_i32_486 = arith.constant 1 : i32
    scf.for %arg12 = %c0_i32_484 to %797 step %c1_i32_486  : i32 {
      %798 = arith.addi %0, %arg12 : i32
      %c8_i32_488 = arith.constant 8 : i32
      %799 = arith.muli %798, %c8_i32_488 : i32
      %c0_i32_489 = arith.constant 0 : i32
      %800 = arith.addi %799, %c0_i32_489 : i32
      %801 = arith.index_cast %800 : i32 to index
      %802 = memref.load %arg3[%801] : memref<64xi32, #tpu.memory_space<smem>>
      %803 = arith.index_cast %802 : i32 to index
      %c0_490 = arith.constant 0 : index
      %804 = vector.load %arg5[%803, %c0_490] : memref<256x128xf32, #tpu.memory_space<vmem>>, vector<1x128xf32>
      %c8_i32_491 = arith.constant 8 : i32
      %805 = arith.muli %arg12, %c8_i32_491 : i32
      %c0_i32_492 = arith.constant 0 : i32
      %806 = arith.addi %805, %c0_i32_492 : i32
      %807 = arith.index_cast %806 : i32 to index
      %c0_493 = arith.constant 0 : index
      %808 = vector.load %arg8[%807, %c0_493] : memref<64x128xf32, #tpu.memory_space<vmem>>, vector<1x128xf32>
      tpu.vector_store %arg8[%807, %c0_493], %804 {strides = array<i32>} : memref<64x128xf32, #tpu.memory_space<vmem>>, vector<1x128xf32>,
      %809 = arith.addi %0, %arg12 : i32
      %c8_i32_494 = arith.constant 8 : i32
      %810 = arith.muli %809, %c8_i32_494 : i32
      %c1_i32_495 = arith.constant 1 : i32
      %811 = arith.addi %810, %c1_i32_495 : i32
      %812 = arith.index_cast %811 : i32 to index
      %813 = memref.load %arg3[%812] : memref<64xi32, #tpu.memory_space<smem>>
      %814 = arith.index_cast %813 : i32 to index
      %c0_496 = arith.constant 0 : index
      %815 = vector.load %arg5[%814, %c0_496] : memref<256x128xf32, #tpu.memory_space<vmem>>, vector<1x128xf32>
      %c8_i32_497 = arith.constant 8 : i32
      %816 = arith.muli %arg12, %c8_i32_497 : i32
      %c1_i32_498 = arith.constant 1 : i32
      %817 = arith.addi %816, %c1_i32_498 : i32
      %818 = arith.index_cast %817 : i32 to index
      %c0_499 = arith.constant 0 : index
      %819 = vector.load %arg8[%818, %c0_499] : memref<64x128xf32, #tpu.memory_space<vmem>>, vector<1x128xf32>
      tpu.vector_store %arg8[%818, %c0_499], %815 {strides = array<i32>} : memref<64x128xf32, #tpu.memory_space<vmem>>, vector<1x128xf32>,
      %820 = arith.addi %0, %arg12 : i32
      %c8_i32_500 = arith.constant 8 : i32
      %821 = arith.muli %820, %c8_i32_500 : i32
      %c2_i32_501 = arith.constant 2 : i32
      %822 = arith.addi %821, %c2_i32_501 : i32
      %823 = arith.index_cast %822 : i32 to index
      %824 = memref.load %arg3[%823] : memref<64xi32, #tpu.memory_space<smem>>
      %825 = arith.index_cast %824 : i32 to index
      %c0_502 = arith.constant 0 : index
      %826 = vector.load %arg5[%825, %c0_502] : memref<256x128xf32, #tpu.memory_space<vmem>>, vector<1x128xf32>
      %c8_i32_503 = arith.constant 8 : i32
      %827 = arith.muli %arg12, %c8_i32_503 : i32
      %c2_i32_504 = arith.constant 2 : i32
      %828 = arith.addi %827, %c2_i32_504 : i32
      %829 = arith.index_cast %828 : i32 to index
      %c0_505 = arith.constant 0 : index
      %830 = vector.load %arg8[%829, %c0_505] : memref<64x128xf32, #tpu.memory_space<vmem>>, vector<1x128xf32>
      tpu.vector_store %arg8[%829, %c0_505], %826 {strides = array<i32>} : memref<64x128xf32, #tpu.memory_space<vmem>>, vector<1x128xf32>,
      %831 = arith.addi %0, %arg12 : i32
      %c8_i32_506 = arith.constant 8 : i32
      %832 = arith.muli %831, %c8_i32_506 : i32
      %c3_i32_507 = arith.constant 3 : i32
      %833 = arith.addi %832, %c3_i32_507 : i32
      %834 = arith.index_cast %833 : i32 to index
      %835 = memref.load %arg3[%834] : memref<64xi32, #tpu.memory_space<smem>>
      %836 = arith.index_cast %835 : i32 to index
      %c0_508 = arith.constant 0 : index
      %837 = vector.load %arg5[%836, %c0_508] : memref<256x128xf32, #tpu.memory_space<vmem>>, vector<1x128xf32>
      %c8_i32_509 = arith.constant 8 : i32
      %838 = arith.muli %arg12, %c8_i32_509 : i32
      %c3_i32_510 = arith.constant 3 : i32
      %839 = arith.addi %838, %c3_i32_510 : i32
      %840 = arith.index_cast %839 : i32 to index
      %c0_511 = arith.constant 0 : index
      %841 = vector.load %arg8[%840, %c0_511] : memref<64x128xf32, #tpu.memory_space<vmem>>, vector<1x128xf32>
      tpu.vector_store %arg8[%840, %c0_511], %837 {strides = array<i32>} : memref<64x128xf32, #tpu.memory_space<vmem>>, vector<1x128xf32>,
      %842 = arith.addi %0, %arg12 : i32
      %c8_i32_512 = arith.constant 8 : i32
      %843 = arith.muli %842, %c8_i32_512 : i32
      %c4_i32_513 = arith.constant 4 : i32
      %844 = arith.addi %843, %c4_i32_513 : i32
      %845 = arith.index_cast %844 : i32 to index
      %846 = memref.load %arg3[%845] : memref<64xi32, #tpu.memory_space<smem>>
      %847 = arith.index_cast %846 : i32 to index
      %c0_514 = arith.constant 0 : index
      %848 = vector.load %arg5[%847, %c0_514] : memref<256x128xf32, #tpu.memory_space<vmem>>, vector<1x128xf32>
      %c8_i32_515 = arith.constant 8 : i32
      %849 = arith.muli %arg12, %c8_i32_515 : i32
      %c4_i32_516 = arith.constant 4 : i32
      %850 = arith.addi %849, %c4_i32_516 : i32
      %851 = arith.index_cast %850 : i32 to index
      %c0_517 = arith.constant 0 : index
      %852 = vector.load %arg8[%851, %c0_517] : memref<64x128xf32, #tpu.memory_space<vmem>>, vector<1x128xf32>
      tpu.vector_store %arg8[%851, %c0_517], %848 {strides = array<i32>} : memref<64x128xf32, #tpu.memory_space<vmem>>, vector<1x128xf32>,
      %853 = arith.addi %0, %arg12 : i32
      %c8_i32_518 = arith.constant 8 : i32
      %854 = arith.muli %853, %c8_i32_518 : i32
      %c5_i32_519 = arith.constant 5 : i32
      %855 = arith.addi %854, %c5_i32_519 : i32
      %856 = arith.index_cast %855 : i32 to index
      %857 = memref.load %arg3[%856] : memref<64xi32, #tpu.memory_space<smem>>
      %858 = arith.index_cast %857 : i32 to index
      %c0_520 = arith.constant 0 : index
      %859 = vector.load %arg5[%858, %c0_520] : memref<256x128xf32, #tpu.memory_space<vmem>>, vector<1x128xf32>
      %c8_i32_521 = arith.constant 8 : i32
      %860 = arith.muli %arg12, %c8_i32_521 : i32
      %c5_i32_522 = arith.constant 5 : i32
      %861 = arith.addi %860, %c5_i32_522 : i32
      %862 = arith.index_cast %861 : i32 to index
      %c0_523 = arith.constant 0 : index
      %863 = vector.load %arg8[%862, %c0_523] : memref<64x128xf32, #tpu.memory_space<vmem>>, vector<1x128xf32>
      tpu.vector_store %arg8[%862, %c0_523], %859 {strides = array<i32>} : memref<64x128xf32, #tpu.memory_space<vmem>>, vector<1x128xf32>,
      %864 = arith.addi %0, %arg12 : i32
      %c8_i32_524 = arith.constant 8 : i32
      %865 = arith.muli %864, %c8_i32_524 : i32
      %c6_i32_525 = arith.constant 6 : i32
      %866 = arith.addi %865, %c6_i32_525 : i32
      %867 = arith.index_cast %866 : i32 to index
      %868 = memref.load %arg3[%867] : memref<64xi32, #tpu.memory_space<smem>>
      %869 = arith.index_cast %868 : i32 to index
      %c0_526 = arith.constant 0 : index
      %870 = vector.load %arg5[%869, %c0_526] : memref<256x128xf32, #tpu.memory_space<vmem>>, vector<1x128xf32>
      %c8_i32_527 = arith.constant 8 : i32
      %871 = arith.muli %arg12, %c8_i32_527 : i32
      %c6_i32_528 = arith.constant 6 : i32
      %872 = arith.addi %871, %c6_i32_528 : i32
      %873 = arith.index_cast %872 : i32 to index
      %c0_529 = arith.constant 0 : index
      %874 = vector.load %arg8[%873, %c0_529] : memref<64x128xf32, #tpu.memory_space<vmem>>, vector<1x128xf32>
      tpu.vector_store %arg8[%873, %c0_529], %870 {strides = array<i32>} : memref<64x128xf32, #tpu.memory_space<vmem>>, vector<1x128xf32>,
      %875 = arith.addi %0, %arg12 : i32
      %c8_i32_530 = arith.constant 8 : i32
      %876 = arith.muli %875, %c8_i32_530 : i32
      %c7_i32_531 = arith.constant 7 : i32
      %877 = arith.addi %876, %c7_i32_531 : i32
      %878 = arith.index_cast %877 : i32 to index
      %879 = memref.load %arg3[%878] : memref<64xi32, #tpu.memory_space<smem>>
      %880 = arith.index_cast %879 : i32 to index
      %c0_532 = arith.constant 0 : index
      %881 = vector.load %arg5[%880, %c0_532] : memref<256x128xf32, #tpu.memory_space<vmem>>, vector<1x128xf32>
      %c8_i32_533 = arith.constant 8 : i32
      %882 = arith.muli %arg12, %c8_i32_533 : i32
      %c7_i32_534 = arith.constant 7 : i32
      %883 = arith.addi %882, %c7_i32_534 : i32
      %884 = arith.index_cast %883 : i32 to index
      %c0_535 = arith.constant 0 : index
      %885 = vector.load %arg8[%884, %c0_535] : memref<64x128xf32, #tpu.memory_space<vmem>>, vector<1x128xf32>
      tpu.vector_store %arg8[%884, %c0_535], %881 {strides = array<i32>} : memref<64x128xf32, #tpu.memory_space<vmem>>, vector<1x128xf32>,
    }
    %c8_i32_487 = arith.constant 8 : i32
    return
  }
  func.func @transform_0(%arg0: i32, %arg1: memref<32xi32, #tpu.memory_space<smem>>, %arg2: memref<32xi32, #tpu.memory_space<smem>>, %arg3: memref<64xi32, #tpu.memory_space<smem>>) -> (i32, i32) {
    %c0_i32 = arith.constant 0 : i32
    %c0_i32_0 = arith.constant 0 : i32
    %c0_i32_1 = arith.constant 0 : i32
    return %c0_i32, %c0_i32_0 : i32, i32
  }
  func.func @transform_1(%arg0: i32, %arg1: memref<32xi32, #tpu.memory_space<smem>>, %arg2: memref<32xi32, #tpu.memory_space<smem>>, %arg3: memref<64xi32, #tpu.memory_space<smem>>) -> (i32, i32) {
    %c0_i32 = arith.constant 0 : i32
    %c0_i32_0 = arith.constant 0 : i32
    %c0_i32_1 = arith.constant 0 : i32
    return %c0_i32, %c0_i32_0 : i32, i32
  }
  func.func @transform_2(%arg0: i32, %arg1: memref<32xi32, #tpu.memory_space<smem>>, %arg2: memref<32xi32, #tpu.memory_space<smem>>, %arg3: memref<64xi32, #tpu.memory_space<smem>>) -> (i32, i32) {
    %c0_i32 = arith.constant 0 : i32
    %c0_i32_0 = arith.constant 0 : i32
    return %arg0, %c0_i32 : i32, i32
  }
  func.func @transform_3(%arg0: i32, %arg1: memref<32xi32, #tpu.memory_space<smem>>, %arg2: memref<32xi32, #tpu.memory_space<smem>>, %arg3: memref<64xi32, #tpu.memory_space<smem>>) -> (i32, i32) {
    %c0_i32 = arith.constant 0 : i32
    %c0_i32_0 = arith.constant 0 : i32
    return %arg0, %c0_i32 : i32, i32
  }
  func.func @transform_4(%arg0: i32, %arg1: memref<32xi32, #tpu.memory_space<smem>>, %arg2: memref<32xi32, #tpu.memory_space<smem>>, %arg3: memref<64xi32, #tpu.memory_space<smem>>) -> (i32, i32) {
    %c0_i32 = arith.constant 0 : i32
    %c0_i32_0 = arith.constant 0 : i32
    return %arg0, %c0_i32 : i32, i32
  }
}

</mosaic_0001>

<bundles_post_ra>
// kernel: tpu_custom_call.1
= control target key start
LH: loop header
LB: loop body
LE: loop exit
PB: predicated region body
PF: predicated region fallthrough
CT: control target
= control target key end

     0   :  { %s1204_s0 = inlined_call_operand.hbm [shape: s32[32], index: 0, kind: input, shape index: {}]   ;;  %s1205_s3 = inlined_call_operand.hbm [shape: f32[256,128], index: 3, kind: input, shape index: {}]   ;;  %s1206_s4 = inlined_call_operand.hbm [shape: f32[256,128], index: 4, kind: input, shape index: {}]   ;;  %s1207_s5 = inlined_call_operand.hbm [shape: f32[8,128], index: 5, kind: output, shape index: {0}]   ;;  %s1208_s6 = inlined_call_operand.hbm [shape: f32[8,128], index: 6, kind: output, shape index: {1}]   ;;  %s1209_s7 = inlined_call_operand.hbm [shape: f32[64,128], index: 7, kind: output, shape index: {2}]   ;;  %s1210_s1 = inlined_call_operand.vmem [shape: s32[32], index: 1, kind: input, shape index: {}]   ;;  %s1211_s2 = inlined_call_operand.vmem [shape: s32[64], index: 2, kind: input, shape index: {}]  }
   0x1   :  { %s756_s26 = scalar_lea.hbm %s1204_s0, 16 }
   0x2   :  { %p757_p0 = scmp.ne.s32.totalorder %s1204_s0, %s756_s26  ;;  %p760_p1 = scmp.lt.u32.totalorder %s756_s26, %s1204_s0 }
   0x4   :  { %p762_p2 = pnand %p760_p1, %p757_p0 }
   0x6   :  { %765 = shalt.err (!%p762_p2)  }
   0x7   :  { %s918_s8 = smov [#allocation6]   ;;  %s15_s13 = sshll.u32 %s1210_s1, 4  ;;  %s16_s13 = int_to_ptr.vmem [resolvable:$true] %s15_s13 }
   0x8   :  { %14 = dma.hbm_to_smem %s1204_s0, 16, %s918_s8, [#allocation5] }
   0x9   :  { %s19_s16 = sshll.u32 %s1211_s2, 4  ;;  %s766_s17 = scalar_lea.vmem %s16_s13, 16  ;;  %s20_s16 = int_to_ptr.vmem [resolvable:$true] %s19_s16 }
   0xa   :  { %p767_p3 = scmp.ne.s32.totalorder %s16_s13, %s766_s17  ;;  %p771_p4 = scmp.lt.s32.totalorder %s16_s13, %s16_s13 }
   0xb   :  { %p772_p5 = scmp.lt.s32.totalorder %s766_s17, %s766_s17 }
   0xd   :  { %p773_p6 = por %p772_p5, %p771_p4 }
   0xf   :  { %p774_p7 = pnand %p773_p6, %p767_p3 }
  0x11   :  { %777 = shalt.err (!%p774_p7)  }
  0x12   :  { %s919_s18 = smov [#allocation7]   ;;  %s778_s0 = scalar_lea.vmem %s20_s16, 16 }
  0x13   :  { %18 = dma.vmem_to_smem %s16_s13, 16, %s919_s18, [#allocation5] }
  0x14   :  { %p779_p8 = scmp.ne.s32.totalorder %s20_s16, %s778_s0  ;;  %p783_p9 = scmp.lt.s32.totalorder %s20_s16, %s20_s16 }
  0x15   :  { %p784_p10 = scmp.lt.s32.totalorder %s778_s0, %s778_s0 }
  0x17   :  { %p785_p11 = por %p784_p10, %p783_p9 }
  0x19   :  { %p786_p12 = pnand %p785_p11, %p779_p8 }
  0x1b   :  { %789 = shalt.err (!%p786_p12)  }
  0x1c   :  { %s920_s1 = smov [#allocation8]  }
  0x1d   :  { %22 = dma.vmem_to_smem %s20_s16, 16, %s920_s1, [#allocation5] }
  0x1e   :  { %904 = dma.done.wait [#allocation5], 48 }
  0x1f   :  { %905 = vsyncadd [#allocation5], 4294967248 }
  0x20   :  { %24 = sfence }
  0x21   :  { %25 = vsyncpa [#allocation10], 0 }
  0x22   :  { %26 = vsyncpa [#allocation13], 0 }
  0x23   :  { %27 = vsyncpa [#allocation11], 0 }
  0x24   :  { %28 = vsyncpa [#allocation16], 0  ;;  %s921_s2 = smov [#allocation9]   ;;  %s790_s22 = scalar_lea.hbm %s1205_s3, 4096 }
  0x25   :  { %s34_s19 = sshll.u32 %s921_s2, 4  ;;  %p791_p13 = scmp.ne.s32.totalorder %s1205_s3, %s790_s22  ;;  %s35_s19 = int_to_ptr.vmem [resolvable:$true] %s34_s19 }
  0x26   :  { %p794_p0 = scmp.lt.u32.totalorder %s790_s22, %s1205_s3 }
  0x28   :  { %p796_p1 = pnand %p794_p0, %p791_p13 }
  0x2a   :  { %799 = shalt.err (!%p796_p1)
}
  0x2b   :  { %s800_s27 = scalar_lea.vmem %s35_s19, 4096  ;;  %p805_p3 = scmp.lt.s32.totalorder %s35_s19, %s35_s19 }
  0x2c   :  { %p801_p2 = scmp.ne.s32.totalorder %s35_s19, %s800_s27  ;;  %p806_p4 = scmp.lt.s32.totalorder %s800_s27, %s800_s27 }
  0x2e   :  { %p807_p5 = por %p806_p4, %p805_p3 }
  0x30   :  { %p808_p6 = pnand %p807_p5, %p801_p2 }
  0x32   :  { %811 = shalt.err (!%p808_p6)
}
  0x33   :  { %s922_s28 = smov 128   ;;  %s923_s29 = smov 8  }
  0x34   :  { %40 = dma.hbm_to_vmem [thread:$0]  %s1205_s3, 4096, %s35_s19, [#allocation10], %s922_s28, %s922_s28, %s923_s29  }
  0x35   :  { %s924_s9 = smov [#allocation12]   ;;  %s812_s13 = scalar_lea.hbm %s1206_s4, 4096 }
  0x36   :  { %s46_s10 = sshll.u32 %s924_s9, 4  ;;  %p813_p7 = scmp.ne.s32.totalorder %s1206_s4, %s812_s13  ;;  %s47_s10 = int_to_ptr.vmem [resolvable:$true] %s46_s10 }
  0x37   :  { %p816_p8 = scmp.lt.u32.totalorder %s812_s13, %s1206_s4 }
  0x39   :  { %p818_p9 = pnand %p816_p8, %p813_p7 }
  0x3b   :  { %821 = shalt.err (!%p818_p9)
}
  0x3c   :  { %s822_s18 = scalar_lea.vmem %s47_s10, 4096  ;;  %p827_p11 = scmp.lt.s32.totalorder %s47_s10, %s47_s10 }
  0x3d   :  { %p823_p10 = scmp.ne.s32.totalorder %s47_s10, %s822_s18  ;;  %p828_p12 = scmp.lt.s32.totalorder %s822_s18, %s822_s18 }
  0x3f   :  { %p829_p13 = por %p828_p12, %p827_p11 }
  0x41   :  { %p830_p0 = pnand %p829_p13, %p823_p10 }
  0x43   :  { %833 = shalt.err (!%p830_p0)
}
  0x44   :  { %52 = dma.hbm_to_vmem [thread:$0]  %s1206_s4, 4096, %s47_s10, [#allocation13], %s922_s28, %s922_s28, %s923_s29  }
  0x45   :  { %906 = dma.done.wait [#allocation10], 4096  }
  0x46   :  { %907 = vsyncadd [#allocation10], 4294963200 }
  0x47   :  { %908 = dma.done.wait [#allocation13], 4096  }
  0x48   :  { %909 = vsyncadd [#allocation13], 4294963200  ;;  %s61_s1 = sld [smem:[#allocation6]]  ;;  %s647_s2 = sld [smem:[#allocation6 + $0x4]]  ;;  %v925_v39 = vmov 0.0  }
  0x49   :  { %s648_s19 = sld [smem:[#allocation6 + $0x8]]  ;;  %s649_s20 = sld [smem:[#allocation6 + $0xc]] }
  0x4a   :  { %s650_s21 = sld [smem:[#allocation6 + $0x10]]  ;;  %s651_s22 = sld [smem:[#allocation6 + $0x14]] }
  0x4b   :  { %s652_s23 = sld [smem:[#allocation6 + $0x18]]  ;;  %s653_s24 = sld [smem:[#allocation6 + $0x1c]] }
  0x4c   :  { %s1017_s25 = sld [smem:[#allocation6 + $0x1]]  ;;  %s1019_s26 = sld [smem:[#allocation6 + $0x5]] }
  0x4d   :  { %s1021_s27 = sld [smem:[#allocation6 + $0x9]]  ;;  %s1023_s30 = sld [smem:[#allocation6 + $0xd]] }
  0x4e   :  { %s62_s4 = scalar_lea.vmem [#allocation9], %s61_s1  ;;  %s68_s8 = scalar_lea.vmem [#allocation9], %s647_s2 }
  0x4f   :  { %v63_v0 = vld [vmem:[%s62_s4] sm:$0x1]  ;;  %s74_s9 = scalar_lea.vmem [#allocation9], %s648_s19  ;;  %s80_s10 = scalar_lea.vmem [#allocation9], %s649_s20 }
  0x50   :  { %v69_v1 = vld [vmem:[%s68_s8] sm:$0x1]  ;;  %64 = vst [vmem:[#allocation2] sm:$0x1] %v63_v0  ;;  %s86_s11 = scalar_lea.vmem [#allocation9], %s650_s21  ;;  %s92_s12 = scalar_lea.vmem [#allocation9], %s651_s22 }
  0x51   :  { %70 = vst [vmem:[#allocation2 + $0x1] sm:$0x1] %v69_v1  ;;  %v75_v2 = vld [vmem:[%s74_s9] sm:$0x1]  ;;  %s98_s13 = scalar_lea.vmem [#allocation9], %s652_s23  ;;  %s104_s14 = scalar_lea.vmem [#allocation9], %s653_s24 }
  0x52   :  { %v81_v3 = vld [vmem:[%s80_s10] sm:$0x1]  ;;  %76 = vst [vmem:[#allocation2 + $0x2] sm:$0x1] %v75_v2  ;;  %s659_s15 = sld [smem:[#allocation6 + $0x11]]  ;;  %s660_s16 = sld [smem:[#allocation6 + $0x15]] }
  0x53   :  { %82 = vst [vmem:[#allocation2 + $0x3] sm:$0x1] %v81_v3  ;;  %v87_v4 = vld [vmem:[%s86_s11] sm:$0x1]  ;;  %s1025_s17 = sld [smem:[#allocation6 + $0x19]]  ;;  %s115_s18 = scalar_lea.vmem [#allocation9], %s1017_s25 }
  0x54   :  { %v93_v5 = vld [vmem:[%s92_s12] sm:$0x1]  ;;  %88 = vst [vmem:[#allocation2 + $0x4] sm:$0x1] %v87_v4  ;;  %s120_s3 = scalar_lea.vmem [#allocation9], %s1019_s26  ;;  %s662_s0 = sld [smem:[#allocation6 + $0x1d]] }
  0x55   :  { %94 = vst [vmem:[#allocation2 + $0x5] sm:$0x1] %v93_v5  ;;  %v99_v6 = vld [vmem:[%s98_s13] sm:$0x1]  ;;  %s1029_s1 = sld [smem:[#allocation6 + $0x2]]  ;;  %s125_s2 = scalar_lea.vmem [#allocation9], %s1021_s27 }
  0x56   :  { %v105_v7 = vld [vmem:[%s104_s14] sm:$0x1]  ;;  %100 = vst [vmem:[#allocation2 + $0x6] sm:$0x1] %v99_v6  ;;  %s1032_s19 = sld [smem:[#allocation6 + $0x6]]  ;;  %s1034_s20 = sld [smem:[#allocation6 + $0xa]] }
  0x57   :  { %106 = vst [vmem:[#allocation2 + $0x7] sm:$0x1] %v105_v7  ;;  %v116_v8 = vld [vmem:[%s115_s18] sm:$0x1]  ;;  %s130_s21 = scalar_lea.vmem [#allocation9], %s1023_s30  ;;  %s1037_s22 = sld [smem:[#allocation6 + $0xe]] }
  0x58   :  { %v121_v9 = vld [vmem:[%s120_s3] sm:$0x1]  ;;  %s1039_s23 = sld [smem:[#allocation6 + $0x12]]  ;;  %s1041_s24 = sld [smem:[#allocation6 + $0x16]] }
  0x59   :  { %v126_v10 = vld [vmem:[%s125_s2] sm:$0x1]  ;;  %s1043_s25 = sld [smem:[#allocation6 + $0x1a]]  ;;  %s1047_s26 = sld [smem:[#allocation6 + $0x1e]] }
  0x5a   :  { %v131_v11 = vld [vmem:[%s130_s21] sm:$0x1]  ;;  %s135_s27 = scalar_lea.vmem [#allocation9], %s659_s15  ;;  %s140_s30 = scalar_lea.vmem [#allocation9], %s660_s16 }
  0x5b   :  { %v136_v13 = vld [vmem:[%s135_s27] sm:$0x1]  ;;  %s145_s4 = scalar_lea.vmem [#allocation9], %s1025_s17  ;;  %s150_s8 = scalar_lea.vmem [#allocation9], %s662_s0 }
  0x5c   :  { %v141_v14 = vld [vmem:[%s140_s30] sm:$0x1]  ;;  %s165_s9 = scalar_lea.vmem [#allocation9], %s1029_s1  ;;  %s170_s10 = scalar_lea.vmem [#allocation9], %s1032_s19 }
  0x5d   :  { %v146_v15 = vld [vmem:[%s145_s4] sm:$0x1]  ;;  %s175_s11 = scalar_lea.vmem [#allocation9], %s1034_s20  ;;  %s180_s12 = scalar_lea.vmem [#allocation9], %s1037_s22 }
  0x5e   :  { %v1045_v12 = vld [vmem:[#allocation2] sm:$0xff]  ;;  %s185_s13 = scalar_lea.vmem [#allocation9], %s1039_s23  ;;  %s190_s14 = scalar_lea.vmem [#allocation9], %s1041_s24 }
  0x5f   :  { %117 = vst [vmem:[#allocation2] sm:$0x1] %v116_v8  ;;  %122 = vst [vmem:[#allocation2 + $0x1] sm:$0x1] %v121_v9  ;;  %v151_v16 = vld [vmem:[%s150_s8] sm:$0x1] }
  0x60   :  { %127 = vst [vmem:[#allocation2 + $0x2] sm:$0x1] %v126_v10  ;;  %132 = vst [vmem:[#allocation2 + $0x3] sm:$0x1] %v131_v11  ;;  %v166_v17 = vld [vmem:[%s165_s9] sm:$0x1] }
  0x61   :  { %137 = vst [vmem:[#allocation2 + $0x4] sm:$0x1] %v136_v13  ;;  %142 = vst [vmem:[#allocation2 + $0x5] sm:$0x1] %v141_v14  ;;  %v171_v18 = vld [vmem:[%s170_s10] sm:$0x1] }
  0x62   :  { %147 = vst [vmem:[#allocation2 + $0x6] sm:$0x1] %v146_v15  ;;  %152 = vst [vmem:[#allocation2 + $0x7] sm:$0x1] %v151_v16  ;;  %v176_v19 = vld [vmem:[%s175_s11] sm:$0x1] }
  0x63   :  { %v181_v20 = vld [vmem:[%s180_s12] sm:$0x1]  ;;  %s673_s15 = sld [smem:[#allocation6 + $0x3]]  ;;  %s674_s16 = sld [smem:[#allocation6 + $0x7]]  ;;  %vm108_vm1 = vcmp.ne.f32.partialorder %v1045_v12, 0.0 }
  0x64   :  { %v186_v21 = vld [vmem:[%s185_s13] sm:$0x1]  ;;  %s195_s17 = scalar_lea.vmem [#allocation9], %s1043_s25  ;;  %s675_s18 = sld [smem:[#allocation6 + $0xb]]  ;;  %v654_v45 = vsel %vm108_vm1, 1.0, %v925_v39 }
  0x65   :  { %v191_v22 = vld [vmem:[%s190_s14] sm:$0x1]  ;;  %s676_s3 = sld [smem:[#allocation6 + $0xf]]  ;;  %s200_s0 = scalar_lea.vmem [#allocation9], %s1047_s26 }
  0x66   :  { %v196_v23 = vld [vmem:[%s195_s17] sm:$0x1]  ;;  %s677_s1 = sld [smem:[#allocation6 + $0x13]]  ;;  %s678_s2 = sld [smem:[#allocation6 + $0x17]] }
  0x67   :  { %v201_v24 = vld [vmem:[%s200_s0] sm:$0x1]  ;;  %s679_s19 = sld [smem:[#allocation6 + $0x1b]]  ;;  %s1058_s21 = sld [smem:[#allocation6 + $0x1f]] }
  0x68   :  { %s1062_s20 = sld [smem:[#allocation7]]  ;;  %s1064_s22 = sld [smem:[#allocation7 + $0x4]] }
  0x69   :  { %v1060_v25 = vld [vmem:[#allocation2] sm:$0xff]  ;;  %s1066_s23 = sld [smem:[#allocation7 + $0x8]]  ;;  %s1068_s24 = sld [smem:[#allocation7 + $0xc]] }
  0x6a   :  { %167 = vst [vmem:[#allocation2] sm:$0x1] %v166_v17  ;;  %172 = vst [vmem:[#allocation2 + $0x1] sm:$0x1] %v171_v18  ;;  %s215_s25 = scalar_lea.vmem [#allocation9], %s673_s15  ;;  %s220_s26 = scalar_lea.vmem [#allocation9], %s674_s16  ;;  %v158_v3 = vadd.f32 %v1060_v25, %v1045_v12 }
  0x6b   :  { %177 = vst [vmem:[#allocation2 + $0x2] sm:$0x1] %v176_v19  ;;  %182 = vst [vmem:[#allocation2 + $0x3] sm:$0x1] %v181_v20  ;;  %v216_v26 = vld [vmem:[%s215_s25] sm:$0x1] }
  0x6c   :  { %187 = vst [vmem:[#allocation2 + $0x4] sm:$0x1] %v186_v21  ;;  %192 = vst [vmem:[#allocation2 + $0x5] sm:$0x1] %v191_v22  ;;  %v221_v27 = vld [vmem:[%s220_s26] sm:$0x1] }
  0x6d   :  { %197 = vst [vmem:[#allocation2 + $0x6] sm:$0x1] %v196_v23  ;;  %202 = vst [vmem:[#allocation2 + $0x7] sm:$0x1] %v201_v24  ;;  %s225_s27 = scalar_lea.vmem [#allocation9], %s675_s18  ;;  %s230_s30 = scalar_lea.vmem [#allocation9], %s676_s3 }
  0x6e   :  { %v226_v28 = vld [vmem:[%s225_s27] sm:$0x1]  ;;  %s235_s4 = scalar_lea.vmem [#allocation9], %s677_s1  ;;  %s240_s8 = scalar_lea.vmem [#allocation9], %s678_s2  ;;  %vm154_vm0 = vcmp.ne.f32.partialorder %v1060_v25, 0.0 }
  0x6f   :  { %v231_v29 = vld [vmem:[%s230_s30] sm:$0x1]  ;;  %s245_s9 = scalar_lea.vmem [#allocation9], %s679_s19  ;;  %s250_s10 = scalar_lea.vmem [#allocation9], %s1058_s21  ;;  %v663_v40 = vsel %vm154_vm0, 1.0, %v925_v39 }
  0x70   :  { %v236_v30 = vld [vmem:[%s235_s4] sm:$0x1]  ;;  %s685_s11 = sld [smem:[#allocation7 + $0x10]]  ;;  %s686_s12 = sld [smem:[#allocation7 + $0x14]]  ;;  %v161_v48 = vadd.f32 %v663_v40, %v654_v45 }
  0x71   :  { %v241_v31 = vld [vmem:[%s240_s8] sm:$0x1]  ;;  %s1073_s13 = sld [smem:[#allocation7 + $0x18]]  ;;  %s1075_s14 = sld [smem:[#allocation7 + $0x1c]] }
  0x72   :  { %v246_v32 = vld [vmem:[%s245_s9] sm:$0x1]  ;;  %s1077_s15 = sld [smem:[#allocation7 + $0x1]]  ;;  %s1079_s16 = sld [smem:[#allocation7 + $0x5]] }
  0x73   :  { %v251_v33 = vld [vmem:[%s250_s10] sm:$0x1]  ;;  %s270_s17 = scalar_lea.vmem [#allocation12], %s1062_s20  ;;  %s274_s18 = scalar_lea.vmem [#allocation12], %s1064_s22 }
  0x74   :  { %v1071_v34 = vld [vmem:[#allocation2] sm:$0xff]  ;;  %s278_s3 = scalar_lea.vmem [#allocation12], %s1066_s23  ;;  %s1085_s0 = sld [smem:[#allocation7 + $0x9]] }
  0x75   :  { %217 = vst [vmem:[#allocation2] sm:$0x1] %v216_v26  ;;  %222 = vst [vmem:[#allocation2 + $0x1] sm:$0x1] %v221_v27  ;;  %v271_v35 = vld [vmem:[%s270_s17] sm:$0x1]  ;;  %v208_v7 = vadd.f32 %v1071_v34, %v158_v3 }
  0x76   :  { %227 = vst [vmem:[#allocation2 + $0x2] sm:$0x1] %v226_v28  ;;  %232 = vst [vmem:[#allocation2 + $0x3] sm:$0x1] %v231_v29  ;;  %v275_v36 = vld [vmem:[%s274_s18] sm:$0x1] }
  0x77   :  { %237 = vst [vmem:[#allocation2 + $0x4] sm:$0x1] %v236_v30  ;;  %242 = vst [vmem:[#allocation2 + $0x5] sm:$0x1] %v241_v31  ;;  %v279_v37 = vld [vmem:[%s278_s3] sm:$0x1] }
  0x78   :  { %247 = vst [vmem:[#allocation2 + $0x6] sm:$0x1] %v246_v32  ;;  %252 = vst [vmem:[#allocation2 + $0x7] sm:$0x1] %v251_v33  ;;  %s1087_s1 = sld [smem:[#allocation7 + $0xd]]  ;;  %s282_s2 = scalar_lea.vmem [#allocation12], %s1068_s24 }
  0x79   :  { %v283_v38 = vld [vmem:[%s282_s2] sm:$0x1]  ;;  %s1090_s19 = sld [smem:[#allocation7 + $0x11]]  ;;  %s1092_s21 = sld [smem:[#allocation7 + $0x15]]  ;;  %vm204_vm2 = vcmp.ne.f32.partialorder %v1071_v34, 0.0 }
  0x7a   :  { %s1094_s25 = sld [smem:[#allocation7 + $0x19]]  ;;  %s1096_s26 = sld [smem:[#allocation7 + $0x1d]]  ;;  %v672_v46 = vsel %vm204_vm2, 1.0, %v925_v39 }
  0x7b   :  { %s286_s20 = scalar_lea.vmem [#allocation12], %s685_s11  ;;  %s290_s22 = scalar_lea.vmem [#allocation12], %s686_s12  ;;  %v211_v49 = vadd.f32 %v672_v46, %v161_v48 }
  0x7c   :  { %v287_v42 = vld [vmem:[%s286_s20] sm:$0x1]  ;;  %s294_s23 = scalar_lea.vmem [#allocation12], %s1073_s13  ;;  %s298_s24 = scalar_lea.vmem [#allocation12], %s1075_s14 }
  0x7d   :  { %v291_v43 = vld [vmem:[%s290_s22] sm:$0x1]  ;;  %s308_s27 = scalar_lea.vmem [#allocation12], %s1077_s15  ;;  %s312_s30 = scalar_lea.vmem [#allocation12], %s1079_s16 }
  0x7e   :  { %v295_v44 = vld [vmem:[%s294_s23] sm:$0x1]  ;;  %s316_s4 = scalar_lea.vmem [#allocation12], %s1085_s0  ;;  %s320_s8 = scalar_lea.vmem [#allocation12], %s1087_s1 }
  0x7f   :  { %v1103_v41 = vld [vmem:[#allocation2] sm:$0xff]  ;;  %s324_s9 = scalar_lea.vmem [#allocation12], %s1090_s19  ;;  %s328_s10 = scalar_lea.vmem [#allocation12], %s1092_s21 }
  0x80   :  { %272 = vst [vmem:[#allocation2] sm:$0x1] %v271_v35  ;;  %276 = vst [vmem:[#allocation2 + $0x1] sm:$0x1] %v275_v36  ;;  %v299_v47 = vld [vmem:[%s298_s24] sm:$0x1]  ;;  %v258_v9 = vadd.f32 %v1103_v41, %v208_v7 }
  0x81   :  { %280 = vst [vmem:[#allocation2 + $0x2] sm:$0x1] %v279_v37  ;;  %284 = vst [vmem:[#allocation2 + $0x3] sm:$0x1] %v283_v38  ;;  %vm254_vm3 = vcmp.ne.f32.partialorder %v1103_v41, 0.0  ;;  %s332_s11 = scalar_lea.vmem [#allocation12], %s1094_s25 }
  0x82   :  { %288 = vst [vmem:[#allocation2 + $0x4] sm:$0x1] %v287_v42  ;;  %292 = vst [vmem:[#allocation2 + $0x5] sm:$0x1] %v291_v43  ;;  %v681_v50 = vsel %vm254_vm3, 1.0, %v925_v39  ;;  %s699_s12 = sld [smem:[#allocation7 + $0x2]] }
  0x83   :  { %296 = vst [vmem:[#allocation2 + $0x6] sm:$0x1] %v295_v44  ;;  %300 = vst [vmem:[#allocation2 + $0x7] sm:$0x1] %v299_v47  ;;  %v309_v51 = vld [vmem:[%s308_s27] sm:$0x1]  ;;  %v261_v58 = vadd.f32 %v681_v50, %v211_v49 }
  0x84   :  { %v313_v52 = vld [vmem:[%s312_s30] sm:$0x1]  ;;  %s700_s13 = sld [smem:[#allocation7 + $0x6]]  ;;  %s336_s14 = scalar_lea.vmem [#allocation12], %s1096_s26 }
  0x85   :  { %v317_v53 = vld [vmem:[%s316_s4] sm:$0x1]  ;;  %s701_s15 = sld [smem:[#allocation7 + $0xa]]  ;;  %s702_s17 = sld [smem:[#allocation7 + $0xe]]  ;;  %v265_v60 = vmax.f32 %v261_v58, 1.0 }
  0x86   :  { %v321_v54 = vld [vmem:[%s320_s8] sm:$0x1]  ;;  %s703_s18 = sld [smem:[#allocation7 + $0x12]]  ;;  %s1123_s16 = sld [smem:[#allocation7 + $0x16]] }
  0x87   :  { %v325_v55 = vld [vmem:[%s324_s9] sm:$0x1]  ;;  %s1125_s3 = sld [smem:[#allocation7 + $0x1a]]  ;;  %s1127_s0 = sld [smem:[#allocation7 + $0x1e]]  ;;  %752 = vrcp.f32 %v265_v60 }
  0x88   :  { %v329_v56 = vld [vmem:[%s328_s10] sm:$0x1]  ;;  %s1131_s1 = sld [smem:[#allocation7 + $0x3]]  ;;  %s1133_s2 = sld [smem:[#allocation7 + $0x7]] }
  0x89   :  { %v333_v57 = vld [vmem:[%s332_s11] sm:$0x1]  ;;  %s1135_s19 = sld [smem:[#allocation7 + $0xb]]  ;;  %s1137_s21 = sld [smem:[#allocation7 + $0xf]] }
  0x8a   :  { %v337_v59 = vld [vmem:[%s336_s14] sm:$0x1]  ;;  %s350_s25 = scalar_lea.vmem [#allocation12], %s699_s12  ;;  %s354_s26 = scalar_lea.vmem [#allocation12], %s700_s13 }
  0x8b   :  { %v1129_v61 = vld [vmem:[#allocation2] sm:$0xff]  ;;  %s358_s20 = scalar_lea.vmem [#allocation12], %s701_s15  ;;  %s362_s22 = scalar_lea.vmem [#allocation12], %s702_s17 }
  0x8c   :  { %310 = vst [vmem:[#allocation2] sm:$0x1] %v309_v51  ;;  %314 = vst [vmem:[#allocation2 + $0x1] sm:$0x1] %v313_v52  ;;  %v351_v62 = vld [vmem:[%s350_s25] sm:$0x1] }
  0x8d   :  { %318 = vst [vmem:[#allocation2 + $0x2] sm:$0x1] %v317_v53  ;;  %322 = vst [vmem:[#allocation2 + $0x3] sm:$0x1] %v321_v54  ;;  %v355_v63 = vld [vmem:[%s354_s26] sm:$0x1] }
  0x8e   :  { %326 = vst [vmem:[#allocation2 + $0x4] sm:$0x1] %v325_v55  ;;  %330 = vst [vmem:[#allocation2 + $0x5] sm:$0x1] %v329_v56  ;;  %v359_v0 = vld [vmem:[%s358_s20] sm:$0x1] }
  0x8f   :  { %334 = vst [vmem:[#allocation2 + $0x6] sm:$0x1] %v333_v57  ;;  %338 = vst [vmem:[#allocation2 + $0x7] sm:$0x1] %v337_v59  ;;  %v363_v1 = vld [vmem:[%s362_s22] sm:$0x1] }
  0x90   :  { %s366_s23 = scalar_lea.vmem [#allocation12], %s703_s18  ;;  %s370_s24 = scalar_lea.vmem [#allocation12], %s1123_s16  ;;  %vm302_vm5 = vcmp.ne.f32.partialorder %v1129_v61, 0.0 }
  0x91   :  { %v367_v2 = vld [vmem:[%s366_s23] sm:$0x1]  ;;  %s374_s27 = scalar_lea.vmem [#allocation12], %s1125_s3  ;;  %s378_s30 = scalar_lea.vmem [#allocation12], %s1127_s0  ;;  %v753_v10 = vpop.eup %752  ;;  %v689_v22 = vsel %vm302_vm5, 1.0, %v925_v39 }
  0x92   :  { %v371_v4 = vld [vmem:[%s370_s24] sm:$0x1]  ;;  %s712_s4 = sld [smem:[#allocation7 + $0x13]]  ;;  %s713_s8 = sld [smem:[#allocation7 + $0x17]]  ;;  %v267_v11 = vmul.f32 %v753_v10, %v258_v9 }
  0x93   :  { %v375_v5 = vld [vmem:[%s374_s27] sm:$0x1]  ;;  %s714_s9 = sld [smem:[#allocation7 + $0x1b]]  ;;  %s715_s10 = sld [smem:[#allocation7 + $0x1f]] }
  0x94   :  { %v379_v6 = vld [vmem:[%s378_s30] sm:$0x1]  ;;  %268 = vst [vmem:[#allocation14] sm:$0xff] %v267_v11  ;;  %s392_s11 = scalar_lea.vmem [#allocation12], %s1131_s1  ;;  %s396_s12 = scalar_lea.vmem [#allocation12], %s1133_s2 }
  0x95   :  { %v393_v12 = vld [vmem:[%s392_s11] sm:$0x1]  ;;  %s400_s13 = scalar_lea.vmem [#allocation12], %s1135_s19  ;;  %s404_s14 = scalar_lea.vmem [#allocation12], %s1137_s21 }
  0x96   :  { %v339_v8 = vld [vmem:[#allocation2] sm:$0xff]  ;;  %s1156_s3 = smov 0  }
  0x97   :  { %352 = vst [vmem:[#allocation2] sm:$0x1] %v351_v62  ;;  %356 = vst [vmem:[#allocation2 + $0x1] sm:$0x1] %v355_v63  ;;  %v397_v13 = vld [vmem:[%s396_s12] sm:$0x1]  ;;  %v344_v30 = vadd.f32 %v339_v8, %v1129_v61 }
  0x98   :  { %360 = vst [vmem:[#allocation2 + $0x2] sm:$0x1] %v359_v0  ;;  %364 = vst [vmem:[#allocation2 + $0x3] sm:$0x1] %v363_v1  ;;  %v401_v14 = vld [vmem:[%s400_s13] sm:$0x1] }
  0x99   :  { %368 = vst [vmem:[#allocation2 + $0x4] sm:$0x1] %v367_v2  ;;  %372 = vst [vmem:[#allocation2 + $0x5] sm:$0x1] %v371_v4  ;;  %v405_v15 = vld [vmem:[%s404_s14] sm:$0x1] }
  0x9a   :  { %376 = vst [vmem:[#allocation2 + $0x6] sm:$0x1] %v375_v5  ;;  %380 = vst [vmem:[#allocation2 + $0x7] sm:$0x1] %v379_v6  ;;  %s408_s15 = scalar_lea.vmem [#allocation12], %s712_s4  ;;  %s412_s17 = scalar_lea.vmem [#allocation12], %s713_s8 }
  0x9b   :  { %v409_v17 = vld [vmem:[%s408_s15] sm:$0x1]  ;;  %s416_s18 = scalar_lea.vmem [#allocation12], %s714_s9  ;;  %s420_s16 = scalar_lea.vmem [#allocation12], %s715_s10  ;;  %vm340_vm4 = vcmp.ne.f32.partialorder %v339_v8, 0.0 }
  0x9c   :  { %v413_v18 = vld [vmem:[%s412_s17] sm:$0x1]  ;;  %v698_v21 = vsel %vm340_vm4, 1.0, %v925_v39 }
  0x9d   :  { %v417_v19 = vld [vmem:[%s416_s18] sm:$0x1]  ;;  %v347_v24 = vadd.f32 %v698_v21, %v689_v22 }
  0x9e   :  { %v421_v20 = vld [vmem:[%s420_s16] sm:$0x1] }
  0xa1   :  { %v381_v16 = vld [vmem:[#allocation2] sm:$0xff] }
  0xa2   :  { %394 = vst [vmem:[#allocation2] sm:$0x1] %v393_v12  ;;  %398 = vst [vmem:[#allocation2 + $0x1] sm:$0x1] %v397_v13  ;;  %vm382_vm6 = vcmp.ne.f32.partialorder %v381_v16, 0.0  ;;  %v386_v31 = vadd.f32 %v381_v16, %v344_v30 }
  0xa3   :  { %402 = vst [vmem:[#allocation2 + $0x2] sm:$0x1] %v401_v14  ;;  %406 = vst [vmem:[#allocation2 + $0x3] sm:$0x1] %v405_v15  ;;  %v707_v23 = vsel %vm382_vm6, 1.0, %v925_v39 }
  0xa4   :  { %410 = vst [vmem:[#allocation2 + $0x4] sm:$0x1] %v409_v17  ;;  %414 = vst [vmem:[#allocation2 + $0x5] sm:$0x1] %v413_v18  ;;  %v389_v26 = vadd.f32 %v707_v23, %v347_v24 }
  0xa5   :  { %418 = vst [vmem:[#allocation2 + $0x6] sm:$0x1] %v417_v19  ;;  %422 = vst [vmem:[#allocation2 + $0x7] sm:$0x1] %v421_v20 }
  0xac   :  { %v423_v25 = vld [vmem:[#allocation2] sm:$0xff] }
  0xad   :  { %vm424_vm7 = vcmp.ne.f32.partialorder %v423_v25, 0.0  ;;  %v428_v32 = vadd.f32 %v423_v25, %v386_v31 }
  0xae   :  { %v716_v27 = vsel %vm424_vm7, 1.0, %v925_v39 }
  0xaf   :  { %v431_v28 = vadd.f32 %v716_v27, %v389_v26 }
  0xb1   :  { %v435_v29 = vmax.f32 %v431_v28, 1.0 }
  0xb3   :  { %754 = vrcp.f32 %v435_v29 }
  0xbd   :  { %v755_v33 = vpop.eup %754 }
  0xbe   :  { %v437_v34 = vmul.f32 %v755_v33, %v428_v32 }
  0xc0   :  { %438 = vst [vmem:[#allocation15] sm:$0xff] %v437_v34 }
  0xc1 LB: > { %s717_s0 = sshll.u32 %s916_s3, 3  ;;  %s444_s3 = sadd.s32 1, %s916_s3   ;;  %s916_s3 = sphi %s1156_s3, %s444_s3  }
  0xc2   : > { %s447_s1 = sld [smem:[#allocation8 + %s717_s0]]  ;;  %s453_s2 = sadd.s32 1, %s717_s0 }
  0xc3   : > { %s460_s19 = sadd.s32 2, %s717_s0  ;;  %s454_s21 = sld [smem:[#allocation8 + %s453_s2]] }
  0xc4   : > { %s461_s25 = sld [smem:[#allocation8 + %s460_s19]]  ;;  %s467_s26 = sadd.s32 3, %s717_s0 }
  0xc5   : > { %s474_s20 = sadd.s32 4, %s717_s0  ;;  %s468_s22 = sld [smem:[#allocation8 + %s467_s26]] }
  0xc6   : > { %s475_s23 = sld [smem:[#allocation8 + %s474_s20]]  ;;  %s481_s24 = sadd.s32 5, %s717_s0 }
  0xc7   : > { %s488_s27 = sadd.s32 6, %s717_s0  ;;  %s482_s30 = sld [smem:[#allocation8 + %s481_s24]] }
  0xc8   : > { %s448_s4 = scalar_lea.vmem [#allocation12], %s447_s1  ;;  %s489_s8 = sld [smem:[#allocation8 + %s488_s27]] }
  0xc9   : > { %v449_v35 = vld [vmem:[%s448_s4] sm:$0x1]  ;;  %s495_s9 = sadd.s32 7, %s717_s0  ;;  %s451_s10 = scalar_lea.vmem [#allocation17], %s717_s0 }
  0xca   : > { %452 = vst [vmem:[%s451_s10] sm:$0x1] %v449_v35  ;;  %s455_s11 = scalar_lea.vmem [#allocation12], %s454_s21  ;;  %s462_s12 = scalar_lea.vmem [#allocation12], %s461_s25 }
  0xcb   : > { %v456_v36 = vld [vmem:[%s455_s11] sm:$0x1]  ;;  %s496_s13 = sld [smem:[#allocation8 + %s495_s9]]  ;;  %s469_s14 = scalar_lea.vmem [#allocation12], %s468_s22 }
  0xcc   : > { %v463_v37 = vld [vmem:[%s462_s12] sm:$0x1]  ;;  %720 = vst [vmem:[%s451_s10 + $0x1] sm:$0x1] %v456_v36  ;;  %s476_s15 = scalar_lea.vmem [#allocation12], %s475_s23  ;;  %p441_p1 = scmp.ge.s32.totalorder %s444_s3, 8  }
  0xcd   : > { %722 = vst [vmem:[%s451_s10 + $0x2] sm:$0x1] %v463_v37  ;;  %v470_v38 = vld [vmem:[%s469_s14] sm:$0x1]  ;;  %s483_s17 = scalar_lea.vmem [#allocation12], %s482_s30  ;;  %s926_s0 = smov (%p441_p1), [#allocation15]  }
  0xce   : > { %v477_v39 = vld [vmem:[%s476_s15] sm:$0x1]  ;;  %724 = vst [vmem:[%s451_s10 + $0x3] sm:$0x1] %v470_v38  ;;  %s490_s18 = scalar_lea.vmem [#allocation12], %s489_s8  ;;  %443 = sbr.rel (!%p441_p1) target bundleno = 193 (0xc1), region = 139 }
  0xcf   : > { %726 = vst [vmem:[%s451_s10 + $0x4] sm:$0x1] %v477_v39  ;;  %v484_v40 = vld [vmem:[%s483_s17] sm:$0x1]  ;;  %s518_s1 = sshll.u32 (%p441_p1), %s926_s0, 4  ;;  %s927_s2 = smov (%p441_p1), [#allocation14]   ;;  %s519_s1 = int_to_ptr.vmem [resolvable:$true] %s518_s1 }
  0xd0   : > { %728 = vst [vmem:[%s451_s10 + $0x5] sm:$0x1] %v484_v40  ;;  %v491_v41 = vld [vmem:[%s490_s18] sm:$0x1]  ;;  %s508_s19 = sshll.u32 (%p441_p1), %s927_s2, 4  ;;  %s834_s21 = scalar_lea.vmem (%p441_p1), %s519_s1, 128  ;;  %s509_s19 = int_to_ptr.vmem [resolvable:$true] %s508_s19 }
  0xd1   : > { %730 = vst [vmem:[%s451_s10 + $0x6] sm:$0x1] %v491_v41  ;;  %s497_s16 = scalar_lea.vmem [#allocation12], %s496_s13  ;;  %p835_p2 = scmp.ne.s32.totalorder (%p441_p1), %s519_s1, %s834_s21 }
  0xd2   : > { %v498_v42 = vld [vmem:[%s497_s16] sm:$0x1]  ;;  %p839_p3 = scmp.lt.s32.totalorder (%p441_p1), %s519_s1, %s519_s1  ;;  %p840_p4 = scmp.lt.s32.totalorder (%p441_p1), %s834_s21, %s834_s21 }
  0xd3   : > { %732 = vst [vmem:[%s451_s10 + $0x7] sm:$0x1] %v498_v42 }
  0xd4   :  { %p841_p5 = por (%p441_p1), %p840_p4, %p839_p3 }
  0xd6   :  { %p842_p6 = pnand %p841_p5, %p835_p2 }
  0xd8   :  { %845 = shalt.err (!%p842_p6)
}
  0xd9   :  { %s846_s20 = scalar_lea.hbm %s1208_s6, 128 }
  0xda   :  { %p847_p7 = scmp.ne.s32.totalorder %s1208_s6, %s846_s20  ;;  %p850_p8 = scmp.lt.u32.totalorder %s846_s20, %s1208_s6 }
  0xdc   :  { %p852_p9 = pnand %p850_p8, %p847_p7 }
  0xde   :  { %855 = shalt.err (!%p852_p9)
}
  0xdf   :  { %521 = dma.vmem_to_hbm [thread:$0]  %s519_s1, 128, %s1208_s6, [#allocation16]  }
  0xe0   :  { %s856_s4 = scalar_lea.vmem %s509_s19, 128  ;;  %p861_p11 = scmp.lt.s32.totalorder %s509_s19, %s509_s19 }
  0xe1   :  { %p857_p10 = scmp.ne.s32.totalorder %s509_s19, %s856_s4  ;;  %p862_p12 = scmp.lt.s32.totalorder %s856_s4, %s856_s4 }
  0xe3   :  { %p863_p13 = por %p862_p12, %p861_p11 }
  0xe5   :  { %p864_p0 = pnand %p863_p13, %p857_p10 }
  0xe7   :  { %867 = shalt.err (!%p864_p0)
}
  0xe8   :  { %s868_s10 = scalar_lea.hbm %s1207_s5, 128 }
  0xe9   :  { %p869_p1 = scmp.ne.s32.totalorder %s1207_s5, %s868_s10  ;;  %p872_p2 = scmp.lt.u32.totalorder %s868_s10, %s1207_s5 }
  0xeb   :  { %p874_p3 = pnand %p872_p2, %p869_p1 }
  0xed   :  { %877 = shalt.err (!%p874_p3)
}
  0xee   :  { %511 = dma.vmem_to_hbm [thread:$0]  %s509_s19, 128, %s1207_s5, [#allocation11]  }
  0xef   :  { %s928_s17 = smov [#allocation17]  }
  0xf0   :  { %s527_s18 = sshll.u32 %s928_s17, 4  ;;  %s528_s18 = int_to_ptr.vmem [resolvable:$true] %s527_s18 }
  0xf1   :  { %s878_s16 = scalar_lea.vmem %s528_s18, 1024  ;;  %p883_p5 = scmp.lt.s32.totalorder %s528_s18, %s528_s18 }
  0xf2   :  { %p879_p4 = scmp.ne.s32.totalorder %s528_s18, %s878_s16  ;;  %p884_p6 = scmp.lt.s32.totalorder %s878_s16, %s878_s16 }
  0xf4   :  { %p885_p7 = por %p884_p6, %p883_p5 }
  0xf6   :  { %p886_p8 = pnand %p885_p7, %p879_p4 }
  0xf8   :  { %889 = shalt.err (!%p886_p8)
}
  0xf9   :  { %s890_s2 = scalar_lea.hbm %s1209_s7, 1024 }
  0xfa   :  { %p891_p9 = scmp.ne.s32.totalorder %s1209_s7, %s890_s2  ;;  %p894_p10 = scmp.lt.u32.totalorder %s890_s2, %s1209_s7 }
  0xfc   :  { %p896_p11 = pnand %p894_p10, %p891_p9 }
  0xfe   :  { %899 = shalt.err (!%p896_p11)
}
  0xff   :  { %533 = dma.vmem_to_hbm [thread:$0]  %s528_s18, 1024, %s1209_s7, [#allocation16], %s922_s28, %s922_s28, %s923_s29  }
 0x100   :  { %910 = dma.done.wait [#allocation11], 128  }
 0x101   :  { %911 = vsyncadd [#allocation11], 4294967168 }
 0x102   :  { %912 = dma.done.wait [#allocation16], 1152  }
 0x103   :  { %913 = vsyncadd [#allocation16], 4294966144 }
 0x104   :  { %543 = vsyncpa [#allocation10], 1 }
 0x105   :  { %544 = vsyncpa [#allocation13], 1 }
 0x106   :  { %545 = vsyncpa [#allocation11], 1 }
 0x107   :  { %546 = vsyncpa [#allocation16], 1 }

</bundles_post_ra>
